<compile_context>
chip_gen: v7x
topology: tpu7x:2x2x1
jax: 0.10.0
libtpu: 0.0.40
codegen_flags: <defaults>
</compile_context>

<pallas_src>
import math

import jax
import jax.numpy as jnp
from jax import lax
from jax.experimental import pallas as pl
from jax.experimental.pallas import tpu as pltpu

KEYDIM = 128   # KeyValue keydim
N_CH = 12      # pooled channels: img(3) m21 m22 qimg(3) pos1 neg1 pos2 neg2


# ----------------------------------------------------------------------------
# Fused Pallas kernel: one grid step == one batch element, everything in VMEM
# ----------------------------------------------------------------------------
def _make_kernel(nh, nw):
    hw = nh * nw
    K = KEYDIM
    C = N_CH

    def kernel(img_ref, qimg_ref, m11_ref, m21_ref, m12_ref, m22_ref,
               pw_ref, a2p_ref, wbig_ref, bbig_ref, rep_ref, rwt_ref,
               srows_ref, rh_ref, o_ref):
        # ---- derived full-res channels (VPU, no HBM round trip) -----------
        m11 = m11_ref[0]
        m21 = m21_ref[0]
        m12 = m12_ref[0]
        m22 = m22_ref[0]
        pos1 = jnp.clip(m21 - m11, 0.0, 1.0)
        neg1 = jnp.clip(m11 - m21, 0.0, 1.0)
        pos2 = jnp.clip(m22 - m12, 0.0, 1.0)
        neg2 = jnp.clip(m12 - m22, 0.0, 1.0)
        x = jnp.concatenate([img_ref[0], m21, m22, qimg_ref[0],
                             pos1, neg1, pos2, neg2], axis=0)      # (C*h, w)

        # ---- separable exact 16x area pooling: 2 matmuls, no kron(ph,pw) --
        y = lax.dot_general(x, pw_ref[...], (((1,), (1,)), ((), ())),
                            preferred_element_type=jnp.float32)    # (C*h, nw)
        z = jnp.dot(a2p_ref[...], y,
                    preferred_element_type=jnp.float32)            # (nh*C, nw)
        # rows of z are (i*C + c); lay the i blocks side by side -> (C, hw)
        pooled = jnp.concatenate(
            [z[i * C:(i + 1) * C, :] for i in range(nh)], axis=1)  # (C, hw)

        # ---- folded encoder + key projections (1/sqrt(K) pre-folded) ------
        kall = jnp.dot(wbig_ref[...], pooled,
                       preferred_element_type=jnp.float32) + bbig_ref[...]
        mk = jnp.concatenate([kall[0:K], kall[K:2 * K]], axis=1)   # (K, 2*hw)
        qk = kall[2 * K:3 * K].T                                   # (hw, K)

        # ---- fused attention scores for both memories: one MXU pass -------
        s = jnp.dot(qk, mk, preferred_element_type=jnp.float32)    # (hw, 2*hw)
        s1 = s[:, 0:hw]
        s2 = s[:, hw:2 * hw]
        e1 = jnp.exp(s1 - jnp.max(s1, axis=-1, keepdims=True))
        e2 = jnp.exp(s2 - jnp.max(s2, axis=-1, keepdims=True))
        inv1 = pl.reciprocal(jnp.sum(e1, axis=-1, keepdims=True), approx=True)
        inv2 = pl.reciprocal(jnp.sum(e2, axis=-1, keepdims=True), approx=True)

        # ---- fused mask readout for both memories: one MXU pass -----------
        masks = pooled[8:12]                                        # (4, hw)
        e_cat = jnp.concatenate([e1, e2], axis=0)                   # (2*hw, hw)
        rd = lax.dot_general(e_cat, masks, (((1,), (1,)), ((), ())),
                             preferred_element_type=jnp.float32)    # (2*hw, 4)
        r4 = jnp.concatenate([rd[0:hw, 0:2] * inv1,
                              rd[hw:2 * hw, 2:4] * inv2], axis=1)   # (hw, 4)
        # r4[q, k] = softmax readout of map k in {pos1, neg1, pos2, neg2}

        # ---- separable bilinear upsample ----------------------------------
        # g[(i,j), k*w + x] = r4[(i,j), k] * rw[x, j]
        g = jnp.dot(r4, rep_ref[...],
                    preferred_element_type=jnp.float32) * rwt_ref[...]  # (hw, 4w)
        # t[i, k*w + x] = sum_j g[(i,j), k*w + x]
        t = jnp.dot(srows_ref[...], g,
                    preferred_element_type=jnp.float32)                 # (nh, 4w)
        # o[y, k*w + x] = sum_i rh[y, i] * t[i, k*w + x]
        o_ref[0] = jnp.dot(rh_ref[...], t,
                           preferred_element_type=jnp.float32
                           ).astype(o_ref.dtype)                        # (h, 4w)

    return kernel


# ----------------------------------------------------------------------------
# Host-built resampling matrices (tiny, constant-folded under jit)
# ----------------------------------------------------------------------------
def _area_matrix(out_size, factor):
    # exact "area" interpolation for an integer downscale == average pooling
    eye = jnp.eye(out_size, dtype=jnp.float32)
    return jnp.repeat(eye, factor, axis=1) / float(factor)     # (out, out*factor)


def _bilinear_matrix(out_size, in_size):
    # PyTorch F.interpolate(mode='bilinear', align_corners=False) weights
    scale = in_size / out_size
    i = jnp.arange(out_size, dtype=jnp.float32)
    src = jnp.maximum((i + 0.5) * scale - 0.5, 0.0)
    i0f = jnp.floor(src)
    frac = src - i0f
    i0 = jnp.clip(i0f.astype(jnp.int32), 0, in_size - 1)
    i1 = jnp.clip(i0 + 1, 0, in_size - 1)
    m = jnp.zeros((out_size, in_size), jnp.float32)
    rows = jnp.arange(out_size)
    m = m.at[rows, i0].add(1.0 - frac)
    m = m.at[rows, i1].add(frac)
    return m                                                   # (out, in)


# ----------------------------------------------------------------------------
# Model
# ----------------------------------------------------------------------------
class AttentionReadNetworkPallas:
    def __init__(self, key):
        ks = jax.random.split(key, 8)
        s = 0.02
        # Stubbed backbones: 16x area pool + 1x1 conv (see TODO above).
        self.w_maskrgb = jax.random.normal(ks[0], (1024, 5), jnp.float32) * s
        self.b_maskrgb = jax.random.normal(ks[1], (1024,), jnp.float32) * s
        self.w_rgb = jax.random.normal(ks[2], (1024, 3), jnp.float32) * s
        self.b_rgb = jax.random.normal(ks[3], (1024,), jnp.float32) * s
        # KeyValue(1024, keydim=128, valdim=512): key branch only is used.
        self.w_km = jax.random.normal(ks[4], (KEYDIM, 1024), jnp.float32) * s
        self.b_km = jax.random.normal(ks[5], (KEYDIM,), jnp.float32) * s
        self.w_kq = jax.random.normal(ks[6], (KEYDIM, 1024), jnp.float32) * s
        self.b_kq = jax.random.normal(ks[7], (KEYDIM,), jnp.float32) * s

        # --- fold encoder conv + key projection (valid while stub is linear)
        # query rows additionally absorb the 1/sqrt(KEYDIM) attention scale
        scale = 1.0 / math.sqrt(KEYDIM)
        w_m_eff = self.w_km @ self.w_maskrgb                    # (128, 5)
        b_m_eff = self.w_km @ self.b_maskrgb + self.b_km        # (128,)
        w_q_eff = (self.w_kq @ self.w_rgb) * scale              # (128, 3)
        b_q_eff = (self.w_kq @ self.b_rgb + self.b_kq) * scale  # (128,)

        # pooled channel order: [img0 img1 img2, m21, m22, q0 q1 q2,
        #                        pos1, neg1, pos2, neg2]
        wbig = jnp.zeros((3 * KEYDIM, N_CH), jnp.float32)
        wbig = wbig.at[0:KEYDIM, 0:5].set(w_m_eff)
        wbig = wbig.at[KEYDIM:2 * KEYDIM, 0:5].set(
            w_m_eff[:, jnp.array([0, 1, 2, 4, 3])])              # swap m21/m22
        wbig = wbig.at[2 * KEYDIM:3 * KEYDIM, 5:8].set(w_q_eff)
        self.w_big = wbig                                        # (384, 12)
        self.b_big = jnp.concatenate(
            [b_m_eff, b_m_eff, b_q_eff])[:, None]                # (384, 1)

    def forward(self, image, mask11, mask21, mask12, mask22, query_image):
        b, _, h, w = mask11.shape
        nh, nw = h // 16, w // 16
        hw = nh * nw
        f32 = jnp.float32

        # free metadata reshapes only — no full-res HBM materialization here
        img = image.reshape(b, 3 * h, w).astype(f32)
        qimg = query_image.reshape(b, 3 * h, w).astype(f32)
        m11 = mask11.reshape(b, h, w).astype(f32)
        m21 = mask21.reshape(b, h, w).astype(f32)
        m12 = mask12.reshape(b, h, w).astype(f32)
        m22 = mask22.reshape(b, h, w).astype(f32)

        # constant resampling operators (depend only on static shapes); all
        # scale linearly with h, w (VMEM-safe on v7x at production sizes).
        ph = _area_matrix(nh, 16)                               # (nh, h)
        pw = _area_matrix(nw, 16)                               # (nw, w)
        # a2p[i*C + c, c'*h + h'] = ph[i, h'] * (c == c')
        a2p = jnp.einsum('ih,cd->icdh', ph,
                         jnp.eye(N_CH, dtype=f32)
                         ).reshape(nh * N_CH, N_CH * h)         # (nh*C, C*h)
        rh = _bilinear_matrix(h, nh)                            # (h, nh)
        rw = _bilinear_matrix(w, nw)                            # (w, nw)
        rwt = jnp.tile(jnp.tile(rw.T, (nh, 1)), (1, 4))         # (hw, 4*w)
        rep = jnp.kron(jnp.eye(4, dtype=f32),
                       jnp.ones((1, w), f32))                   # (4, 4*w)
        srows = jnp.kron(jnp.eye(nh, dtype=f32),
                         jnp.ones((1, nw), f32))                # (nh, hw)

        def const2d(shape):
            return pl.BlockSpec(shape, lambda i: (0, 0))

        out = pl.pallas_call(
            _make_kernel(nh, nw),
            out_shape=jax.ShapeDtypeStruct((b, h, 4 * w), f32),
            grid=(b,),
            in_specs=[
                pl.BlockSpec((1, 3 * h, w), lambda i: (i, 0, 0)),   # image
                pl.BlockSpec((1, 3 * h, w), lambda i: (i, 0, 0)),   # query img
                pl.BlockSpec((1, h, w), lambda i: (i, 0, 0)),       # mask11
                pl.BlockSpec((1, h, w), lambda i: (i, 0, 0)),       # mask21
                pl.BlockSpec((1, h, w), lambda i: (i, 0, 0)),       # mask12
                pl.BlockSpec((1, h, w), lambda i: (i, 0, 0)),       # mask22
                const2d((nw, w)),                                   # pw
                const2d((nh * N_CH, N_CH * h)),                     # a2p
                const2d((3 * KEYDIM, N_CH)),                        # w_big
                const2d((3 * KEYDIM, 1)),                           # b_big
                const2d((4, 4 * w)),                                # rep
                const2d((hw, 4 * w)),                               # rwt
                const2d((nh, hw)),                                  # srows
                const2d((h, nh)),                                   # rh
            ],
            out_specs=pl.BlockSpec((1, h, 4 * w), lambda i: (i, 0, 0)),
            compiler_params=pltpu.CompilerParams(
                dimension_semantics=("parallel",)),
        )(img, qimg, m11, m21, m12, m22,
          pw, a2p, self.w_big, self.b_big, rep, rwt, srows, rh)

        # TODO(synk): for w >= 128 write (b, 4, h, w) directly from the kernel
        # and drop this transpose; at w < 128 the packed (h, 4*w) block is the
        # lane-dense choice.
        maps = out.reshape(b, h, 4, w).transpose(0, 2, 1, 3)     # (B, 4, h, w)
        return maps[:, 0:2], maps[:, 2:4]


# ----------------------------------------------------------------------------
# Pure-jnp reference (unfused, same linear-stub backbones) for validation
# ----------------------------------------------------------------------------
def _reference_forward(net, image, mask11, mask21, mask12, mask22, query_image):
    b, _, h, w = mask11.shape
    nh, nw = h // 16, w // 16
    hw = nh * nw

    def pool(x):                                    # exact 'area' interpolation
        B, C = x.shape[:2]
        return x.reshape(B, C, nh, 16, nw, 16).mean(axis=(3, 5))

    def conv1x1(x, wgt, bias):
        return (jnp.einsum('bchw,oc->bohw', x, wgt,
                           precision=lax.Precision.HIGHEST)
                + bias[None, :, None, None])

    f16_1 = conv1x1(pool(jnp.concatenate([image, mask21, mask22], 1)),
                    net.w_maskrgb, net.b_maskrgb)
    f16_2 = conv1x1(pool(jnp.concatenate([image, mask22, mask21], 1)),
                    net.w_maskrgb, net.b_maskrgb)
    qf16 = conv1x1(pool(query_image), net.w_rgb, net.b_rgb)
    k16_1 = conv1x1(f16_1, net.w_km, net.b_km)
    k16_2 = conv1x1(f16_2, net.w_km, net.b_km)
    qk16 = conv1x1(qf16, net.w_kq, net.b_kq)

    def memory(mk, qk):                             # AttentionMemory
        mkf = mk.reshape(b, KEYDIM, hw).transpose(0, 2, 1)
        qkf = qk.reshape(b, KEYDIM, hw) / math.sqrt(KEYDIM)
        aff = jnp.einsum('bmc,bcq->bmq', mkf, qkf,
                         precision=lax.Precision.HIGHEST)
        return jax.nn.softmax(aff, axis=1)

    W1, W2 = memory(k16_1, qk16), memory(k16_2, qk16)

    rh = _bilinear_matrix(h, nh)
    rw = _bilinear_matrix(w, nw)

    def read(pos, neg, Wt):
        pm = pool(pos).reshape(b, 1, hw) @ Wt
        nm = pool(neg).reshape(b, 1, hw) @ Wt
        a = jnp.concatenate([pm, nm], axis=1).reshape(b, 2, nh, nw)
        return jnp.einsum('ym,bcmn,xn->bcyx', rh, a, rw,
                          precision=lax.Precision.HIGHEST)

    pos1 = jnp.clip(mask21 - mask11, 0.0, 1.0)
    neg1 = jnp.clip(mask11 - mask21, 0.0, 1.0)
    pos2 = jnp.clip(mask22 - mask12, 0.0, 1.0)
    neg2 = jnp.clip(mask12 - mask22, 0.0, 1.0)
    return read(pos1, neg1, W1), read(pos2, neg2, W2)


# ----------------------------------------------------------------------------
if __name__ == "__main__":
    key = jax.random.PRNGKey(0)
    kk = jax.random.split(key, 7)
    B, H, W = 2, 64, 64

    image = jax.random.normal(kk[0], (B, 3, H, W), jnp.float32)
    query_image = jax.random.normal(kk[1], (B, 3, H, W), jnp.float32)
    mask11 = jax.random.uniform(kk[2], (B, 1, H, W), jnp.float32)
    mask21 = jax.random.uniform(kk[3], (B, 1, H, W), jnp.float32)
    mask12 = jax.random.uniform(kk[4], (B, 1, H, W), jnp.float32)
    mask22 = jax.random.uniform(kk[5], (B, 1, H, W), jnp.float32)

    net = AttentionReadNetworkPallas(kk[6])
    attn_map1, attn_map2 = jax.jit(net.forward)(
        image, mask11, mask21, mask12, mask22, query_image
    )
    jax.block_until_ready((attn_map1, attn_map2))

    ref1, ref2 = _reference_forward(
        net, image, mask11, mask21, mask12, mask22, query_image
    )

    assert attn_map1.shape == (B, 2, H, W) and attn_map1.dtype == jnp.float32
    assert attn_map2.shape == (B, 2, H, W) and attn_map2.dtype == jnp.float32
    assert bool(jnp.all(jnp.isfinite(attn_map1)))
    assert bool(jnp.all(jnp.isfinite(attn_map2)))
    assert bool(jnp.allclose(attn_map1, ref1, rtol=5e-2, atol=5e-3))
    assert bool(jnp.allclose(attn_map2, ref2, rtol=5e-2, atol=5e-3))
    print("KERNEL_OK")
</pallas_src>

<mosaic_0001>
module attributes {stable_mosaic.version = 11 : i64} {
  func.func private @main(%arg0: i32) attributes {dimension_semantics = [#tpu.dimension_semantics<core_parallel>], iteration_bounds = array<i64: 2>, tpu.core_type = #tpu.core_type<sc_scalar_subcore>, window_params = []} {
    return
  }
}

module attributes {stable_mosaic.version = 11 : i64} {
  func.func private @main(%arg0: i32) attributes {dimension_semantics = [#tpu.dimension_semantics<core_parallel>], iteration_bounds = array<i64: 2>, tpu.core_type = #tpu.core_type<sc_scalar_subcore>, window_params = []} {
    return
  }
}

module attributes {stable_mosaic.version = 11 : i64} {
  func.func @kernel(%arg0: i32, %arg1: memref<1x192x64xf32, #tpu.memory_space<vmem>>, %arg2: memref<1x192x64xf32, #tpu.memory_space<vmem>>, %arg3: memref<1x64x64xf32, #tpu.memory_space<vmem>>, %arg4: memref<1x64x64xf32, #tpu.memory_space<vmem>>, %arg5: memref<1x64x64xf32, #tpu.memory_space<vmem>>, %arg6: memref<1x64x64xf32, #tpu.memory_space<vmem>>, %arg7: memref<4x64xf32, #tpu.memory_space<vmem>>, %arg8: memref<48x768xf32, #tpu.memory_space<vmem>>, %arg9: memref<384x12xf32, #tpu.memory_space<vmem>>, %arg10: memref<384x1xf32, #tpu.memory_space<vmem>>, %arg11: memref<4x256xf32, #tpu.memory_space<vmem>>, %arg12: memref<16x256xf32, #tpu.memory_space<vmem>>, %arg13: memref<4x16xf32, #tpu.memory_space<vmem>>, %arg14: memref<64x4xf32, #tpu.memory_space<vmem>>, %arg15: memref<1x64x256xf32, #tpu.memory_space<vmem>>) attributes {dimension_semantics = [#tpu.dimension_semantics<parallel>], iteration_bounds = array<i64: 2>, scalar_prefetch = 0 : i64, scratch_operands = 0 : i64, tpu.core_type = #tpu.core_type<tc>, window_params = [{transform_indices = @transform_0, window_bounds = array<i64: 1, 192, 64>}, {transform_indices = @transform_1, window_bounds = array<i64: 1, 192, 64>}, {transform_indices = @transform_2, window_bounds = array<i64: 1, 64, 64>}, {transform_indices = @transform_3, window_bounds = array<i64: 1, 64, 64>}, {transform_indices = @transform_4, window_bounds = array<i64: 1, 64, 64>}, {transform_indices = @transform_5, window_bounds = array<i64: 1, 64, 64>}, {pipeline_mode = #tpu.pipeline_mode<synchronous>, transform_indices = @transform_6, window_bounds = array<i64: 4, 64>}, {pipeline_mode = #tpu.pipeline_mode<synchronous>, transform_indices = @transform_7, window_bounds = array<i64: 48, 768>}, {pipeline_mode = #tpu.pipeline_mode<synchronous>, transform_indices = @transform_8, window_bounds = array<i64: 384, 12>}, {pipeline_mode = #tpu.pipeline_mode<synchronous>, transform_indices = @transform_9, window_bounds = array<i64: 384, 1>}, {pipeline_mode = #tpu.pipeline_mode<synchronous>, transform_indices = @transform_10, window_bounds = array<i64: 4, 256>}, {pipeline_mode = #tpu.pipeline_mode<synchronous>, transform_indices = @transform_11, window_bounds = array<i64: 16, 256>}, {pipeline_mode = #tpu.pipeline_mode<synchronous>, transform_indices = @transform_12, window_bounds = array<i64: 4, 16>}, {pipeline_mode = #tpu.pipeline_mode<synchronous>, transform_indices = @transform_13, window_bounds = array<i64: 64, 4>}, {transform_indices = @transform_14, window_bounds = array<i64: 1, 64, 256>}]} {
    %c0 = arith.constant 0 : index
    %c0_0 = arith.constant 0 : index
    %c0_1 = arith.constant 0 : index
    %0 = vector.load %arg3[%c0, %c0_0, %c0_1] : memref<1x64x64xf32, #tpu.memory_space<vmem>>, vector<1x64x64xf32>
    %1 = vector.shape_cast %0 : vector<1x64x64xf32> to vector<64x64xf32>
    %c0_2 = arith.constant 0 : index
    %c0_3 = arith.constant 0 : index
    %c0_4 = arith.constant 0 : index
    %2 = vector.load %arg4[%c0_2, %c0_3, %c0_4] : memref<1x64x64xf32, #tpu.memory_space<vmem>>, vector<1x64x64xf32>
    %3 = vector.shape_cast %2 : vector<1x64x64xf32> to vector<64x64xf32>
    %c0_5 = arith.constant 0 : index
    %c0_6 = arith.constant 0 : index
    %c0_7 = arith.constant 0 : index
    %4 = vector.load %arg5[%c0_5, %c0_6, %c0_7] : memref<1x64x64xf32, #tpu.memory_space<vmem>>, vector<1x64x64xf32>
    %5 = vector.shape_cast %4 : vector<1x64x64xf32> to vector<64x64xf32>
    %c0_8 = arith.constant 0 : index
    %c0_9 = arith.constant 0 : index
    %c0_10 = arith.constant 0 : index
    %6 = vector.load %arg6[%c0_8, %c0_9, %c0_10] : memref<1x64x64xf32, #tpu.memory_space<vmem>>, vector<1x64x64xf32>
    %7 = vector.shape_cast %6 : vector<1x64x64xf32> to vector<64x64xf32>
    %8 = arith.subf %3, %1 : vector<64x64xf32>
    %cst = arith.constant 0.000000e+00 : f32
    %cst_11 = arith.constant 1.000000e+00 : f32
    %9 = vector.broadcast %cst : f32 to vector<64x64xf32>
    %10 = arith.maximumf %9, %8 : vector<64x64xf32>
    %11 = vector.broadcast %cst_11 : f32 to vector<64x64xf32>
    %12 = arith.minimumf %11, %10 : vector<64x64xf32>
    %13 = arith.subf %1, %3 : vector<64x64xf32>
    %cst_12 = arith.constant 0.000000e+00 : f32
    %cst_13 = arith.constant 1.000000e+00 : f32
    %14 = vector.broadcast %cst_12 : f32 to vector<64x64xf32>
    %15 = arith.maximumf %14, %13 : vector<64x64xf32>
    %16 = vector.broadcast %cst_13 : f32 to vector<64x64xf32>
    %17 = arith.minimumf %16, %15 : vector<64x64xf32>
    %18 = arith.subf %7, %5 : vector<64x64xf32>
    %cst_14 = arith.constant 0.000000e+00 : f32
    %cst_15 = arith.constant 1.000000e+00 : f32
    %19 = vector.broadcast %cst_14 : f32 to vector<64x64xf32>
    %20 = arith.maximumf %19, %18 : vector<64x64xf32>
    %21 = vector.broadcast %cst_15 : f32 to vector<64x64xf32>
    %22 = arith.minimumf %21, %20 : vector<64x64xf32>
    %23 = arith.subf %5, %7 : vector<64x64xf32>
    %cst_16 = arith.constant 0.000000e+00 : f32
    %cst_17 = arith.constant 1.000000e+00 : f32
    %24 = vector.broadcast %cst_16 : f32 to vector<64x64xf32>
    %25 = arith.maximumf %24, %23 : vector<64x64xf32>
    %26 = vector.broadcast %cst_17 : f32 to vector<64x64xf32>
    %27 = arith.minimumf %26, %25 : vector<64x64xf32>
    %c0_18 = arith.constant 0 : index
    %c0_19 = arith.constant 0 : index
    %c0_20 = arith.constant 0 : index
    %28 = vector.load %arg1[%c0_18, %c0_19, %c0_20] : memref<1x192x64xf32, #tpu.memory_space<vmem>>, vector<1x192x64xf32>
    %29 = vector.shape_cast %28 : vector<1x192x64xf32> to vector<192x64xf32>
    %c0_21 = arith.constant 0 : index
    %c0_22 = arith.constant 0 : index
    %c0_23 = arith.constant 0 : index
    %30 = vector.load %arg2[%c0_21, %c0_22, %c0_23] : memref<1x192x64xf32, #tpu.memory_space<vmem>>, vector<1x192x64xf32>
    %31 = vector.shape_cast %30 : vector<1x192x64xf32> to vector<192x64xf32>
    %32 = tpu.concatenate %29, %3, %7, %31, %12, %17, %22, %27 in 0 : vector<192x64xf32>, vector<64x64xf32>, vector<64x64xf32>, vector<192x64xf32>, vector<64x64xf32>, vector<64x64xf32>, vector<64x64xf32>, vector<64x64xf32> -> vector<768x64xf32>
    %c0_24 = arith.constant 0 : index
    %c0_25 = arith.constant 0 : index
    %33 = vector.load %arg7[%c0_24, %c0_25] : memref<4x64xf32, #tpu.memory_space<vmem>>, vector<4x64xf32>
    %cst_26 = arith.constant dense<0.000000e+00> : vector<768x4xf32>
    %34 = tpu.matmul %32, %33, %cst_26 {dimension_numbers = #tpu.dot_dimension_numbers<[1], [1], [0], [0], [0, 0, 1, 0], [], []>} : vector<768x64xf32>, vector<4x64xf32>, vector<768x4xf32> -> vector<768x4xf32>
    %c0_27 = arith.constant 0 : index
    %c0_28 = arith.constant 0 : index
    %35 = vector.load %arg8[%c0_27, %c0_28] : memref<48x768xf32, #tpu.memory_space<vmem>>, vector<48x768xf32>
    %cst_29 = arith.constant dense<0.000000e+00> : vector<48x4xf32>
    %36 = tpu.matmul %35, %34, %cst_29 {dimension_numbers = #tpu.dot_dimension_numbers<[1], [0], [0], [1], [0, 0, 1, 1], [], []>} : vector<48x768xf32>, vector<768x4xf32>, vector<48x4xf32> -> vector<48x4xf32>
    %37 = vector.extract_strided_slice %36 {offsets = [0, 0], sizes = [12, 4], strides = [1, 1]} : vector<48x4xf32> to vector<12x4xf32>
    %38 = vector.extract_strided_slice %36 {offsets = [12, 0], sizes = [12, 4], strides = [1, 1]} : vector<48x4xf32> to vector<12x4xf32>
    %39 = vector.extract_strided_slice %36 {offsets = [24, 0], sizes = [12, 4], strides = [1, 1]} : vector<48x4xf32> to vector<12x4xf32>
    %40 = vector.extract_strided_slice %36 {offsets = [36, 0], sizes = [12, 4], strides = [1, 1]} : vector<48x4xf32> to vector<12x4xf32>
    %41 = tpu.concatenate %37, %38, %39, %40 in 1 : vector<12x4xf32>, vector<12x4xf32>, vector<12x4xf32>, vector<12x4xf32> -> vector<12x16xf32>
    %c0_30 = arith.constant 0 : index
    %c0_31 = arith.constant 0 : index
    %42 = vector.load %arg9[%c0_30, %c0_31] : memref<384x12xf32, #tpu.memory_space<vmem>>, vector<384x12xf32>
    %cst_32 = arith.constant dense<0.000000e+00> : vector<384x16xf32>
    %43 = tpu.matmul %42, %41, %cst_32 {dimension_numbers = #tpu.dot_dimension_numbers<[1], [0], [0], [1], [0, 0, 1, 1], [], []>} : vector<384x12xf32>, vector<12x16xf32>, vector<384x16xf32> -> vector<384x16xf32>
    %c0_33 = arith.constant 0 : index
    %c0_34 = arith.constant 0 : index
    %44 = vector.load %arg10[%c0_33, %c0_34] : memref<384x1xf32, #tpu.memory_space<vmem>>, vector<384x1xf32>
    %45 = vector.broadcast %44 : vector<384x1xf32> to vector<384x16xf32>
    %46 = arith.addf %43, %45 : vector<384x16xf32>
    %47 = vector.extract_strided_slice %46 {offsets = [0, 0], sizes = [128, 16], strides = [1, 1]} : vector<384x16xf32> to vector<128x16xf32>
    %48 = vector.extract_strided_slice %46 {offsets = [128, 0], sizes = [128, 16], strides = [1, 1]} : vector<384x16xf32> to vector<128x16xf32>
    %49 = tpu.concatenate %47, %48 in 1 : vector<128x16xf32>, vector<128x16xf32> -> vector<128x32xf32>
    %50 = vector.extract_strided_slice %46 {offsets = [256, 0], sizes = [128, 16], strides = [1, 1]} : vector<384x16xf32> to vector<128x16xf32>
    %51 = tpu.transpose %50, [1, 0] : vector<128x16xf32> -> vector<16x128xf32>
    %cst_35 = arith.constant dense<0.000000e+00> : vector<16x32xf32>
    %52 = tpu.matmul %51, %49, %cst_35 {dimension_numbers = #tpu.dot_dimension_numbers<[1], [0], [0], [1], [0, 0, 1, 1], [], []>} : vector<16x128xf32>, vector<128x32xf32>, vector<16x32xf32> -> vector<16x32xf32>
    %53 = vector.extract_strided_slice %52 {offsets = [0, 0], sizes = [16, 16], strides = [1, 1]} : vector<16x32xf32> to vector<16x16xf32>
    %54 = vector.extract_strided_slice %52 {offsets = [0, 16], sizes = [16, 16], strides = [1, 1]} : vector<16x32xf32> to vector<16x16xf32>
    %cst_36 = arith.constant dense<0xFF800000> : vector<16xf32>
    %55 = vector.multi_reduction <maximumf>, %53, %cst_36 [1] : vector<16x16xf32> to vector<16xf32>
    %56 = vector.shape_cast %55 : vector<16xf32> to vector<16x1xf32>
    %57 = vector.broadcast %56 : vector<16x1xf32> to vector<16x16xf32>
    %58 = arith.subf %53, %57 : vector<16x16xf32>
    %59 = math.exp %58 : vector<16x16xf32>
    %cst_37 = arith.constant dense<0xFF800000> : vector<16xf32>
    %60 = vector.multi_reduction <maximumf>, %54, %cst_37 [1] : vector<16x16xf32> to vector<16xf32>
    %61 = vector.shape_cast %60 : vector<16xf32> to vector<16x1xf32>
    %62 = vector.broadcast %61 : vector<16x1xf32> to vector<16x16xf32>
    %63 = arith.subf %54, %62 : vector<16x16xf32>
    %64 = math.exp %63 : vector<16x16xf32>
    %cst_38 = arith.constant dense<0.000000e+00> : vector<16xf32>
    %65 = vector.multi_reduction <add>, %59, %cst_38 [1] : vector<16x16xf32> to vector<16xf32>
    %66 = vector.shape_cast %65 : vector<16xf32> to vector<16x1xf32>
    %67 = tpu.reciprocal %66 {approx = true} : vector<16x1xf32> -> vector<16x1xf32>
    %cst_39 = arith.constant dense<0.000000e+00> : vector<16xf32>
    %68 = vector.multi_reduction <add>, %64, %cst_39 [1] : vector<16x16xf32> to vector<16xf32>
    %69 = vector.shape_cast %68 : vector<16xf32> to vector<16x1xf32>
    %70 = tpu.reciprocal %69 {approx = true} : vector<16x1xf32> -> vector<16x1xf32>
    %71 = vector.extract_strided_slice %41 {offsets = [8, 0], sizes = [4, 16], strides = [1, 1]} : vector<12x16xf32> to vector<4x16xf32>
    %72 = tpu.concatenate %59, %64 in 0 : vector<16x16xf32>, vector<16x16xf32> -> vector<32x16xf32>
    %cst_40 = arith.constant dense<0.000000e+00> : vector<32x4xf32>
    %73 = tpu.matmul %72, %71, %cst_40 {dimension_numbers = #tpu.dot_dimension_numbers<[1], [1], [0], [0], [0, 0, 1, 0], [], []>} : vector<32x16xf32>, vector<4x16xf32>, vector<32x4xf32> -> vector<32x4xf32>
    %74 = vector.extract_strided_slice %73 {offsets = [0, 0], sizes = [16, 2], strides = [1, 1]} : vector<32x4xf32> to vector<16x2xf32>
    %75 = vector.broadcast %67 : vector<16x1xf32> to vector<16x2xf32>
    %76 = arith.mulf %74, %75 : vector<16x2xf32>
    %77 = vector.extract_strided_slice %73 {offsets = [16, 2], sizes = [16, 2], strides = [1, 1]} : vector<32x4xf32> to vector<16x2xf32>
    %78 = vector.broadcast %70 : vector<16x1xf32> to vector<16x2xf32>
    %79 = arith.mulf %77, %78 : vector<16x2xf32>
    %80 = tpu.concatenate %76, %79 in 1 : vector<16x2xf32>, vector<16x2xf32> -> vector<16x4xf32>
    %c0_41 = arith.constant 0 : index
    %c0_42 = arith.constant 0 : index
    %81 = vector.load %arg11[%c0_41, %c0_42] : memref<4x256xf32, #tpu.memory_space<vmem>>, vector<4x256xf32>
    %cst_43 = arith.constant dense<0.000000e+00> : vector<16x256xf32>
    %82 = tpu.matmul %80, %81, %cst_43 {dimension_numbers = #tpu.dot_dimension_numbers<[1], [0], [0], [1], [0, 0, 1, 1], [], []>} : vector<16x4xf32>, vector<4x256xf32>, vector<16x256xf32> -> vector<16x256xf32>
    %c0_44 = arith.constant 0 : index
    %c0_45 = arith.constant 0 : index
    %83 = vector.load %arg12[%c0_44, %c0_45] : memref<16x256xf32, #tpu.memory_space<vmem>>, vector<16x256xf32>
    %84 = arith.mulf %82, %83 : vector<16x256xf32>
    %c0_46 = arith.constant 0 : index
    %c0_47 = arith.constant 0 : index
    %85 = vector.load %arg13[%c0_46, %c0_47] : memref<4x16xf32, #tpu.memory_space<vmem>>, vector<4x16xf32>
    %cst_48 = arith.constant dense<0.000000e+00> : vector<4x256xf32>
    %86 = tpu.matmul %85, %84, %cst_48 {dimension_numbers = #tpu.dot_dimension_numbers<[1], [0], [0], [1], [0, 0, 1, 1], [], []>} : vector<4x16xf32>, vector<16x256xf32>, vector<4x256xf32> -> vector<4x256xf32>
    %c0_49 = arith.constant 0 : index
    %c0_50 = arith.constant 0 : index
    %87 = vector.load %arg14[%c0_49, %c0_50] : memref<64x4xf32, #tpu.memory_space<vmem>>, vector<64x4xf32>
    %cst_51 = arith.constant dense<0.000000e+00> : vector<64x256xf32>
    %88 = tpu.matmul %87, %86, %cst_51 {dimension_numbers = #tpu.dot_dimension_numbers<[1], [0], [0], [1], [0, 0, 1, 1], [], []>} : vector<64x4xf32>, vector<4x256xf32>, vector<64x256xf32> -> vector<64x256xf32>
    %c0_52 = arith.constant 0 : index
    %c0_53 = arith.constant 0 : index
    %c0_54 = arith.constant 0 : index
    %89 = vector.load %arg15[%c0_52, %c0_53, %c0_54] : memref<1x64x256xf32, #tpu.memory_space<vmem>>, vector<1x64x256xf32>
    %90 = vector.shape_cast %89 : vector<1x64x256xf32> to vector<64x256xf32>
    %91 = vector.shape_cast %88 : vector<64x256xf32> to vector<1x64x256xf32>
    tpu.vector_store %arg15[%c0_52, %c0_53, %c0_54], %91 {strides = array<i32>} : memref<1x64x256xf32, #tpu.memory_space<vmem>>, vector<1x64x256xf32>,
    return
  }
  func.func @transform_0(%arg0: i32) -> (i32, i32, i32) {
    %c0_i32 = arith.constant 0 : i32
    %c0_i32_0 = arith.constant 0 : i32
    %c0_i32_1 = arith.constant 0 : i32
    return %arg0, %c0_i32, %c0_i32_0 : i32, i32, i32
  }
  func.func @transform_1(%arg0: i32) -> (i32, i32, i32) {
    %c0_i32 = arith.constant 0 : i32
    %c0_i32_0 = arith.constant 0 : i32
    %c0_i32_1 = arith.constant 0 : i32
    return %arg0, %c0_i32, %c0_i32_0 : i32, i32, i32
  }
  func.func @transform_2(%arg0: i32) -> (i32, i32, i32) {
    %c0_i32 = arith.constant 0 : i32
    %c0_i32_0 = arith.constant 0 : i32
    %c0_i32_1 = arith.constant 0 : i32
    return %arg0, %c0_i32, %c0_i32_0 : i32, i32, i32
  }
  func.func @transform_3(%arg0: i32) -> (i32, i32, i32) {
    %c0_i32 = arith.constant 0 : i32
    %c0_i32_0 = arith.constant 0 : i32
    %c0_i32_1 = arith.constant 0 : i32
    return %arg0, %c0_i32, %c0_i32_0 : i32, i32, i32
  }
  func.func @transform_4(%arg0: i32) -> (i32, i32, i32) {
    %c0_i32 = arith.constant 0 : i32
    %c0_i32_0 = arith.constant 0 : i32
    %c0_i32_1 = arith.constant 0 : i32
    return %arg0, %c0_i32, %c0_i32_0 : i32, i32, i32
  }
  func.func @transform_5(%arg0: i32) -> (i32, i32, i32) {
    %c0_i32 = arith.constant 0 : i32
    %c0_i32_0 = arith.constant 0 : i32
    %c0_i32_1 = arith.constant 0 : i32
    return %arg0, %c0_i32, %c0_i32_0 : i32, i32, i32
  }
  func.func @transform_6(%arg0: i32) -> (i32, i32) {
    %c0_i32 = arith.constant 0 : i32
    %c0_i32_0 = arith.constant 0 : i32
    %c0_i32_1 = arith.constant 0 : i32
    return %c0_i32, %c0_i32_0 : i32, i32
  }
  func.func @transform_7(%arg0: i32) -> (i32, i32) {
    %c0_i32 = arith.constant 0 : i32
    %c0_i32_0 = arith.constant 0 : i32
    %c0_i32_1 = arith.constant 0 : i32
    return %c0_i32, %c0_i32_0 : i32, i32
  }
  func.func @transform_8(%arg0: i32) -> (i32, i32) {
    %c0_i32 = arith.constant 0 : i32
    %c0_i32_0 = arith.constant 0 : i32
    %c0_i32_1 = arith.constant 0 : i32
    return %c0_i32, %c0_i32_0 : i32, i32
  }
  func.func @transform_9(%arg0: i32) -> (i32, i32) {
    %c0_i32 = arith.constant 0 : i32
    %c0_i32_0 = arith.constant 0 : i32
    %c0_i32_1 = arith.constant 0 : i32
    return %c0_i32, %c0_i32_0 : i32, i32
  }
  func.func @transform_10(%arg0: i32) -> (i32, i32) {
    %c0_i32 = arith.constant 0 : i32
    %c0_i32_0 = arith.constant 0 : i32
    %c0_i32_1 = arith.constant 0 : i32
    return %c0_i32, %c0_i32_0 : i32, i32
  }
  func.func @transform_11(%arg0: i32) -> (i32, i32) {
    %c0_i32 = arith.constant 0 : i32
    %c0_i32_0 = arith.constant 0 : i32
    %c0_i32_1 = arith.constant 0 : i32
    return %c0_i32, %c0_i32_0 : i32, i32
  }
  func.func @transform_12(%arg0: i32) -> (i32, i32) {
    %c0_i32 = arith.constant 0 : i32
    %c0_i32_0 = arith.constant 0 : i32
    %c0_i32_1 = arith.constant 0 : i32
    return %c0_i32, %c0_i32_0 : i32, i32
  }
  func.func @transform_13(%arg0: i32) -> (i32, i32) {
    %c0_i32 = arith.constant 0 : i32
    %c0_i32_0 = arith.constant 0 : i32
    %c0_i32_1 = arith.constant 0 : i32
    return %c0_i32, %c0_i32_0 : i32, i32
  }
  func.func @transform_14(%arg0: i32) -> (i32, i32, i32) {
    %c0_i32 = arith.constant 0 : i32
    %c0_i32_0 = arith.constant 0 : i32
    %c0_i32_1 = arith.constant 0 : i32
    return %arg0, %c0_i32, %c0_i32_0 : i32, i32, i32
  }
}

</mosaic_0001>

<bundles_post_ra>
// kernel: tile.17
= control target key start
LH: loop header
LB: loop body
LE: loop exit
PB: predicated region body
PF: predicated region fallthrough
CT: control target
= control target key end

     0   :  { %s300_s22 = smov 3  ;;  %vm82_vm0 = vcmask 523264   ;;  %s302_s23 = smov 3  ;;  %vm178_vm1 = vcmask 1047556   ;;  %vm182_vm2 = vcmask 1048064   ;;  %s419_s0 = inlined_call_operand.vmem [shape: f32[16,4,64], index: 0, kind: input, shape index: {}]   ;;  %s420_s1 = inlined_call_operand.vmem [shape: f32[16,256], index: 1, kind: output, shape index: {}]  }
   0x1   :  { %v239_v0 = vld [vmem:[%s419_s0 + $0x1c] sm:$0xf]  ;;  %v240_v1 = vld [vmem:[%s419_s0 + $0x18] sm:$0xf]  ;;  %v241_v2 = vld [vmem:[%s419_s0 + $0x14] sm:$0xf] }
   0x2   :  { %48 = vst [vmem:[#allocation0 + $0x38] sm:$0xf] %v239_v0  ;;  %53 = vst [vmem:[#allocation0 + $0x30] sm:$0xf] %v240_v1  ;;  %v242_v3 = vld [vmem:[%s419_s0 + $0x10] sm:$0xf] }
   0x3   :  { %58 = vst [vmem:[#allocation0 + $0x28] sm:$0xf] %v241_v2  ;;  %v243_v4 = vld [vmem:[%s419_s0 + $0xc] sm:$0xf]  ;;  %v244_v5 = vld [vmem:[%s419_s0 + $0x8] sm:$0xf] }
   0x4   :  { %63 = vst [vmem:[#allocation0 + $0x20] sm:$0xf] %v242_v3  ;;  %68 = vst [vmem:[#allocation0 + $0x18] sm:$0xf] %v243_v4  ;;  %v245_v6 = vld [vmem:[%s419_s0 + $0x4] sm:$0xf] }
   0x5   :  { %73 = vst [vmem:[#allocation0 + $0x10] sm:$0xf] %v244_v5  ;;  %v78_v7 = vld [vmem:[%s419_s0] sm:$0xf]  ;;  %77 = vst [vmem:[#allocation0 + $0x8] sm:$0xf] %v245_v6 }
   0x6   :  { %79 = vst [vmem:[#allocation0] sm:$0xf] %v78_v7  ;;  %s91_s24 = smov 3  ;;  %v231_v8 = vld [vmem:[%s419_s0 + $0x3c] sm:$0xf]  ;;  %s97_s27 = smov 3 }
   0x7   :  { %s103_s28 = smov 3  ;;  %8 = vst [vmem:[#allocation0 + $0x78] sm:$0xf] %v231_v8  ;;  %v232_v9 = vld [vmem:[%s419_s0 + $0x38] sm:$0xf]  ;;  %s109_s4 = smov 3 }
   0x8   :  { %v233_v10 = vld [vmem:[%s419_s0 + $0x34] sm:$0xf]  ;;  %s115_s5 = smov 3  ;;  %13 = vst [vmem:[#allocation0 + $0x70] sm:$0xf] %v232_v9  ;;  %s325_s14 = smov 3 }
   0x9   :  { %18 = vst [vmem:[#allocation0 + $0x68] sm:$0xf] %v233_v10  ;;  %v234_v11 = vld [vmem:[%s419_s0 + $0x30] sm:$0xf]  ;;  %v235_v12 = vld [vmem:[%s419_s0 + $0x2c] sm:$0xf] }
   0xa   :  { %23 = vst [vmem:[#allocation0 + $0x60] sm:$0xf] %v234_v11  ;;  %28 = vst [vmem:[#allocation0 + $0x58] sm:$0xf] %v235_v12  ;;  %v236_v13 = vld [vmem:[%s419_s0 + $0x28] sm:$0xf] }
   0xb   :  { %v237_v14 = vld [vmem:[%s419_s0 + $0x24] sm:$0xf]  ;;  %33 = vst [vmem:[#allocation0 + $0x50] sm:$0xf] %v236_v13  ;;  %v238_v15 = vld [vmem:[%s419_s0 + $0x20] sm:$0xf] }
   0xc   :  { %38 = vst [vmem:[#allocation0 + $0x48] sm:$0xf] %v237_v14  ;;  %s330_s0 = smov 3  ;;  %s332_s17 = smov 3  ;;  %v110_v16 = vld [vmem:[#allocation0 + $0x28] ss:$2 sm:%s109_s4]  }
   0xd   :  { %v116_v17 = vld [vmem:[#allocation0 + $0x30] ss:$2 sm:%s115_s5]   ;;  %43 = vst [vmem:[#allocation0 + $0x40] sm:$0xf] %v238_v15  ;;  %s139_s18 = smov 3  ;;  %s145_s19 = smov 3 }
   0xe   :  { %v92_v18 = vld [vmem:[#allocation0 + $0x10] ss:$2 sm:%s91_s24]   ;;  %v104_v20 = vld [vmem:[#allocation0 + $0x20] ss:$2 sm:%s103_s28]   ;;  %s151_s30 = smov 3  ;;  %s157_s2 = smov 3 }
   0xf   :  { %v98_v19 = vld [vmem:[#allocation0 + $0x18] ss:$2 sm:%s97_s27]   ;;  %250 = vst.msk [vmem:[%s420_s1 + $0x5] ss:$8 sm:$0x3] %vm82_vm0, %v110_v16   ;;  %s163_s7 = smov 3 }
  0x10   :  { %251 = vst.msk [vmem:[%s420_s1 + $0x6] ss:$8 sm:$0x3] %vm82_vm0, %v116_v17   ;;  %v81_v21 = vld [vmem:[#allocation0] ss:$2 sm:%s300_s22]   ;;  %s169_s8 = smov 3 }
  0x11   :  { %v86_v22 = vld [vmem:[#allocation0 + $0x8] ss:$2 sm:%s302_s23]   ;;  %247 = vst.msk [vmem:[%s420_s1 + $0x2] ss:$8 sm:$0x3] %vm82_vm0, %v92_v18   ;;  %s265_s9 = smov 64  }
  0x12   :  { %248 = vst.msk [vmem:[%s420_s1 + $0x3] ss:$8 sm:$0x3] %vm82_vm0, %v98_v19   ;;  %249 = vst.msk [vmem:[%s420_s1 + $0x4] ss:$8 sm:$0x3] %vm82_vm0, %v104_v20  }
  0x13   :  { %83 = vst.msk [vmem:[%s420_s1] ss:$8 sm:$0x3] %vm82_vm0, %v81_v21   ;;  %246 = vst.msk [vmem:[%s420_s1 + $0x1] ss:$8 sm:$0x3] %vm82_vm0, %v86_v22  }
  0x14   :  { %v175_v23 = vld [vmem:[#allocation0 + $0x1] ss:$8 sm:$0xf]   ;;  %v158_v26 = vld [vmem:[#allocation0 + $0x68] ss:$2 sm:%s157_s2]  }
  0x15   :  { %v177_v24 = vld [vmem:[#allocation0 + $0x1] ss:$8 sm:$0xf0]   ;;  %v146_v27 = vld [vmem:[#allocation0 + $0x58] ss:$2 sm:%s145_s19]  }
  0x16   :  { %v179_v25 = vsel %vm178_vm1, %v177_v24, %v175_v23  ;;  %v152_v28 = vld [vmem:[#allocation0 + $0x60] ss:$2 sm:%s151_s30]   ;;  %258 = vst.msk [vmem:[%s420_s1 + $0x15] ss:$8 sm:$0x3] %vm82_vm0, %v158_v26  }
  0x17   :  { %180 = vrot.lane.b32.xlu0 %v179_v25, %s265_s9  ;;  %v164_v29 = vld [vmem:[#allocation0 + $0x70] ss:$2 sm:%s163_s7]   ;;  %256 = vst.msk [vmem:[%s420_s1 + $0x13] ss:$8 sm:$0x3] %vm82_vm0, %v146_v27  }
  0x18   :  { %v134_v30 = vld [vmem:[#allocation0 + $0x48] ss:$2 sm:%s332_s17]   ;;  %257 = vst.msk [vmem:[%s420_s1 + $0x14] ss:$8 sm:$0x3] %vm82_vm0, %v152_v28  }
  0x19   :  { %v140_v31 = vld [vmem:[#allocation0 + $0x50] ss:$2 sm:%s139_s18]   ;;  %259 = vst.msk [vmem:[%s420_s1 + $0x16] ss:$8 sm:$0x3] %vm82_vm0, %v164_v29  }
  0x1a   :  { %v170_v32 = vld [vmem:[#allocation0 + $0x78] ss:$2 sm:%s169_s8]   ;;  %254 = vst.msk [vmem:[%s420_s1 + $0x11] ss:$8 sm:$0x3] %vm82_vm0, %v134_v30  }
  0x1b   :  { %v122_v33 = vld [vmem:[#allocation0 + $0x38] ss:$2 sm:%s325_s14]   ;;  %255 = vst.msk [vmem:[%s420_s1 + $0x12] ss:$8 sm:$0x3] %vm82_vm0, %v140_v31  }
  0x1c   :  { %v128_v34 = vld [vmem:[#allocation0 + $0x40] ss:$2 sm:%s330_s0]   ;;  %260 = vst.msk [vmem:[%s420_s1 + $0x17] ss:$8 sm:$0x3] %vm82_vm0, %v170_v32  }
  0x1d   :  { %252 = vst.msk [vmem:[%s420_s1 + $0x7] ss:$8 sm:$0x3] %vm82_vm0, %v122_v33   ;;  %253 = vst.msk [vmem:[%s420_s1 + $0x10] ss:$8 sm:$0x3] %vm82_vm0, %v128_v34  }
  0x1e   :  { %v196_v35 = vld [vmem:[#allocation0 + $0x41] ss:$8 sm:$0xf]   ;;  %v185_v38 = vld [vmem:[#allocation0 + $0x3] ss:$8 sm:$0xf]  }
  0x1f   :  { %v198_v36 = vld [vmem:[#allocation0 + $0x41] ss:$8 sm:$0xf0]   ;;  %v187_v39 = vld [vmem:[#allocation0 + $0x3] ss:$8 sm:$0xf0]  }
  0x20   :  { %v200_v37 = vsel %vm178_vm1, %v198_v36, %v196_v35  ;;  %v189_v40 = vsel %vm178_vm1, %v187_v39, %v185_v38  ;;  %v207_v41 = vld [vmem:[#allocation0 + $0x43] ss:$8 sm:$0xf]  }
  0x21   :  { %201 = vrot.lane.b32.xlu1 %v200_v37, %s265_s9  ;;  %v209_v42 = vld [vmem:[#allocation0 + $0x43] ss:$8 sm:$0xf0]   ;;  %190 = vrot.lane.b32.xlu0 %v189_v40, %s265_s9 }
  0x22   :  { %v211_v43 = vsel %vm178_vm1, %v209_v42, %v207_v41 }
  0x25   :  { %212 = vrot.lane.b32.xlu1 %v211_v43, %s265_s9 }
  0x89   :  { %v181_v44 = vpop.permute.xlu0 %180  }
  0x8a   :  { %183 = vst.msk [vmem:[%s420_s1] sm:$0xff] %vm182_vm2, %v181_v44  }
  0x93   :  { %v202_v45 = vpop.permute.xlu1 %201   ;;  %v191_v46 = vpop.permute.xlu0 %190  }
  0x94   :  { %262 = vst.msk [vmem:[%s420_s1 + $0x10] sm:$0xff] %vm182_vm2, %v202_v45   ;;  %261 = vst.msk [vmem:[%s420_s1 + $0x8] sm:$0xff] %vm182_vm2, %v191_v46  }
  0x97   :  { %v213_v47 = vpop.permute.xlu1 %212  }
  0x98   :  { %263 = vst.msk [vmem:[%s420_s1 + $0x18] sm:$0xff] %vm182_vm2, %v213_v47  }

// kernel: forward.1
= control target key start
LH: loop header
LB: loop body
LE: loop exit
PB: predicated region body
PF: predicated region fallthrough
CT: control target
= control target key end

     0   :  { %s4608_s29 = smov 0   ;;  %s5738_s0 = inlined_call_operand.vmem [shape: f32[2,192,64], index: 0, kind: input, shape index: {}]   ;;  %s5739_s1 = inlined_call_operand.vmem [shape: f32[2,192,64], index: 1, kind: input, shape index: {}]   ;;  %s5740_s2 = inlined_call_operand.vmem [shape: f32[2,64,64], index: 2, kind: input, shape index: {}]   ;;  %s5741_s3 = inlined_call_operand.vmem [shape: f32[2,64,64], index: 3, kind: input, shape index: {}]   ;;  %s5742_s4 = inlined_call_operand.vmem [shape: f32[2,64,64], index: 4, kind: input, shape index: {}]   ;;  %s5743_s5 = inlined_call_operand.vmem [shape: f32[2,64,64], index: 5, kind: input, shape index: {}]   ;;  %s5744_s6 = inlined_call_operand.vmem [shape: f32[4,64], index: 6, kind: input, shape index: {}]   ;;  %s5745_s7 = inlined_call_operand.vmem [shape: f32[48,768], index: 7, kind: input, shape index: {}]   ;;  %s5746_s8 = inlined_call_operand.vmem [shape: f32[384,12], index: 8, kind: input, shape index: {}]   ;;  %s5747_s9 = inlined_call_operand.vmem [shape: f32[384,1], index: 9, kind: input, shape index: {}]   ;;  %s5748_s10 = inlined_call_operand.vmem [shape: f32[4,256], index: 10, kind: input, shape index: {}]   ;;  %s5749_s11 = inlined_call_operand.vmem [shape: f32[16,256], index: 11, kind: input, shape index: {}]   ;;  %s5750_s12 = inlined_call_operand.vmem [shape: f32[4,16], index: 12, kind: input, shape index: {}]   ;;  %s5751_s13 = inlined_call_operand.vmem [shape: f32[64,4], index: 13, kind: input, shape index: {}]   ;;  %s5752_s14 = inlined_call_operand.vmem [shape: f32[2,64,256], index: 14, kind: output, shape index: {}]  }
   0x1 LB: > { %s3526_s30 = sadd.s32 4294967295, %s4523_s29   ;;  %p3530_p0 = scmp.ge.s32.totalorder %s4523_s29, 1  ;;  %s4523_s29 = sphi %s4608_s29, %s24_s29  }
   0x2   : > { %p462_p1 = scmp.lt.s32.totalorder %s4523_s29, 3 }
   0x4   : > { %p463_p2 = pnand %p3530_p0, %p462_p1 }
   0x5   : > { %v744_v0 = vld [vmem:[%s5744_s6] sm:$0xf] (!%p463_p2)  ;;  %vm745_vm0 = vcmask (!%p463_p2), 523264   ;;  %p533_p3 = scmp.lt.s32.totalorder (!%p463_p2), %s3526_s30, 1  ;;  %s4525_s25 = smov (!%p463_p2), 4   ;;  %vm1905_vm1 = vcmask (!%p463_p2), 1043456  }
   0x6   : > { %466 = sbr.rel (%p463_p2) target bundleno = 2612 (0xa34), region = 76  ;;  %4036 = vmatprep.subr.msk.mxu0 (!%p463_p2), %vm745_vm0, %v744_v0  ;;  %s4526_s26 = smov (!%p463_p2), 8   ;;  %vm1939_vm2 = vcmask (!%p463_p2), 97280   ;;  %vm1933_vm3 = vcmask (!%p463_p2), 31744   ;;  %vm1936_vm4 = vcmask (!%p463_p2), 64512   ;;  %vm4529_vm5 = vmmov (!%p463_p2), 1  }
   0x7   : > { %4037 = vmatpush3.xpose.msk.msra.mxu0 (!%p463_p2), %vm745_vm0, %v744_v0  ;;  %s4527_s15 = smov (!%p463_p2), 12   ;;  %vm4398_vm6 = vmpackc.low (!%p463_p2), %vm1905_vm1, %vm4529_vm5  ;;  %vm2794_vm7 = vcmask (!%p463_p2), 130048   ;;  %vm2930_vm8 = vcmask (!%p463_p2), 261248   ;;  %vm3068_vm9 = vcmask (!%p463_p2), 15360  }
   0xd   : > { %s5763_s30 = smov (!%p533_p3, %s3526_s30), 1 }
   0xe   : > { %s4441_s17 = smul.u32 192, %s5763_s30  ;;  %s4625_s18 = sshll.u32 %s5763_s30, 6 }
   0xf   : > { %s4631_s21 = scalar_lea.vmem %s5740_s2, %s4625_s18  ;;  %s4637_s24 = scalar_lea.vmem %s5741_s3, %s4625_s18 }
  0x10   : > { %s4644_s27 = scalar_lea.vmem %s5738_s0, %s4441_s17  ;;  %v4647_v1 = vld [vmem:[%s4631_s21] sm:$0xff]  ;;  %v4666_v10 = vld [vmem:[%s4631_s21 + $0x8] sm:$0xff]  ;;  %v4675_v14 = vld [vmem:[%s4631_s21 + $0x10] sm:$0xff]  ;;  %s4722_s16 = scalar_lea.vmem %s5742_s4, %s4625_s18 }
  0x11   : > { %v4650_v2 = vld [vmem:[%s4637_s24] sm:$0xff]  ;;  %v697_v4 = vld [vmem:[%s4644_s27 + $0x8] sm:$0xff]  ;;  %v698_v5 = vld [vmem:[%s4644_s27 + $0x10] sm:$0xff]  ;;  %s4738_s22 = scalar_lea.vmem %s5743_s5, %s4625_s18  ;;  %s4897_s23 = scalar_lea.vmem %s5739_s1, %s4441_s17 }
  0x12   : > { %v696_v3 = vld [vmem:[%s4644_s27] sm:$0xff]  ;;  %v600_v6 = vsub.f32 %v4650_v2, %v4647_v1  ;;  %v624_v7 = vsub.f32 %v4647_v1, %v4650_v2  ;;  %v699_v8 = vld [vmem:[%s4644_s27 + $0x18] sm:$0xff]  ;;  %v701_v11 = vld [vmem:[%s4644_s27 + $0x28] sm:$0xff]  ;;  %s4530_s18 = smov 16  }
  0x13   : > { %4038 = vmatprep.mubr.msk.f32.mxu0 %vm745_vm0, %v696_v3  ;;  %v700_v9 = vld [vmem:[%s4644_s27 + $0x20] sm:$0xff]  ;;  %v702_v12 = vld [vmem:[%s4644_s27 + $0x30] sm:$0xff]  ;;  %v4672_v13 = vld [vmem:[%s4637_s24 + $0x8] sm:$0xff] }
  0x14   : > { %4039 = vmatmul.mubr.msk.f32.vlgmr.msra.gmra.mrb[0].mxu0 %vm745_vm0, %v697_v4  ;;  %v4678_v15 = vld [vmem:[%s4637_s24 + $0x10] sm:$0xff]  ;;  %v601_v16 = vsub.f32 %v4672_v13, %v4666_v10  ;;  %v625_v17 = vsub.f32 %v4666_v10, %v4672_v13  ;;  %v4689_v20 = vld [vmem:[%s4631_s21 + $0x18] sm:$0xff]  ;;  %v4695_v22 = vld [vmem:[%s4631_s21 + $0x20] sm:$0xff] }
  0x15   : > { %4041 = vmatprep.mubr.msk.f32.mxu0 %vm745_vm0, %v698_v5  ;;  %v602_v18 = vsub.f32 %v4678_v15, %v4675_v14  ;;  %v626_v19 = vsub.f32 %v4675_v14, %v4678_v15  ;;  %v4692_v21 = vld [vmem:[%s4637_s24 + $0x18] sm:$0xff]  ;;  %v4705_v26 = vld [vmem:[%s4637_s24 + $0x20] sm:$0xff]  ;;  %v4713_v30 = vld [vmem:[%s4631_s21 + $0x28] sm:$0xff] }
  0x16   : > { %v603_v23 = vsub.f32 %v4692_v21, %v4689_v20  ;;  %v627_v24 = vsub.f32 %v4689_v20, %v4692_v21  ;;  %v703_v25 = vld [vmem:[%s4644_s27 + $0x38] sm:$0xff]  ;;  %v704_v27 = vld [vmem:[%s4644_s27 + $0x40] sm:$0xff]  ;;  %v604_v28 = vsub.f32 %v4705_v26, %v4695_v22  ;;  %v628_v29 = vsub.f32 %v4695_v22, %v4705_v26  ;;  %v4716_v31 = vld [vmem:[%s4631_s21 + $0x30] sm:$0xff] }
  0x17   : > { %v4725_v32 = vld [vmem:[%s4631_s21 + $0x38] sm:$0xff]  ;;  %v4729_v33 = vld [vmem:[%s4637_s24 + $0x28] sm:$0xff]  ;;  %v4732_v34 = vld [vmem:[%s4637_s24 + $0x30] sm:$0xff] }
  0x18   : > { %4042 = vmatmul.mubr.msk.f32.gmra.mrb[2].mxu0 %vm745_vm0, %v699_v8  ;;  %v705_v35 = vld [vmem:[%s4644_s27 + $0x48] sm:$0xff]  ;;  %v605_v36 = vsub.f32 %v4729_v33, %v4713_v30  ;;  %v629_v37 = vsub.f32 %v4713_v30, %v4729_v33  ;;  %v606_v38 = vsub.f32 %v4732_v34, %v4716_v31  ;;  %v630_v39 = vsub.f32 %v4716_v31, %v4732_v34  ;;  %v4751_v40 = vld [vmem:[%s4637_s24 + $0x38] sm:$0xff]  ;;  %v4754_v41 = vld [vmem:[%s4722_s16] sm:$0xff] }
  0x19   : > { %4044 = vmatprep.mubr.msk.f32.mxu0 %vm745_vm0, %v700_v9  ;;  %v706_v42 = vld [vmem:[%s4644_s27 + $0x50] sm:$0xff]  ;;  %v607_v43 = vsub.f32 %v4751_v40, %v4725_v32  ;;  %v631_v44 = vsub.f32 %v4725_v32, %v4751_v40  ;;  %v4762_v45 = vld [vmem:[%s4738_s22] sm:$0xff]  ;;  %v4770_v48 = vld [vmem:[%s4722_s16 + $0x8] sm:$0xff]  ;;  %v635_v1 = vmax.f32 %v627_v24, 0.0 }
  0x1a   : > { %v648_v46 = vsub.f32 %v4762_v45, %v4754_v41  ;;  %v4773_v49 = vld [vmem:[%s4722_s16 + $0x10] sm:$0xff]  ;;  %v707_v50 = vld [vmem:[%s4644_s27 + $0x58] sm:$0xff]  ;;  %v708_v52 = vld [vmem:[%s4644_s27 + $0x60] sm:$0xff] }
  0x1b   : > { %v4778_v51 = vld [vmem:[%s4722_s16 + $0x18] sm:$0xff]  ;;  %v4782_v53 = vld [vmem:[%s4738_s22 + $0x8] sm:$0xff]  ;;  %v4785_v54 = vld [vmem:[%s4738_s22 + $0x10] sm:$0xff]  ;;  %v643_v10 = vmin.f32 %v635_v1, 1.0 }
  0x1c   : > { %4045 = vmatmul.mubr.msk.f32.gmra.mrb[4].mxu0 %vm745_vm0, %v701_v11  ;;  %v649_v55 = vsub.f32 %v4782_v53, %v4770_v48  ;;  %v650_v57 = vsub.f32 %v4785_v54, %v4773_v49  ;;  %v4796_v59 = vld [vmem:[%s4738_s22 + $0x18] sm:$0xff]  ;;  %v4799_v60 = vld [vmem:[%s4722_s16 + $0x20] sm:$0xff]  ;;  %v709_v63 = vld [vmem:[%s4644_s27 + $0x68] sm:$0xff] }
  0x1d   : > { %4047 = vmatprep.mubr.msk.f32.mxu0 %vm745_vm0, %v702_v12  ;;  %v651_v61 = vsub.f32 %v4796_v59, %v4778_v51  ;;  %v4809_v0 = vld [vmem:[%s4738_s22 + $0x20] sm:$0xff]  ;;  %v710_v3 = vld [vmem:[%s4644_s27 + $0x70] sm:$0xff]  ;;  %v4817_v8 = vld [vmem:[%s4722_s16 + $0x28] sm:$0xff] }
  0x1e   : > { %v652_v4 = vsub.f32 %v4809_v0, %v4799_v60  ;;  %v4820_v9 = vld [vmem:[%s4722_s16 + $0x30] sm:$0xff]  ;;  %v4823_v11 = vld [vmem:[%s4722_s16 + $0x38] sm:$0xff]  ;;  %v4827_v12 = vld [vmem:[%s4738_s22 + $0x28] sm:$0xff]  ;;  %v657_v24 = vmax.f32 %v649_v55, 0.0 }
  0x1f   : > { %v714_v58 = vld [vmem:[%s4644_s27 + $0x90] sm:$0xff]  ;;  %v716_v56 = vld [vmem:[%s4644_s27 + $0xa0] sm:$0xff]  ;;  %v717_v47 = vld [vmem:[%s4644_s27 + $0xa8] sm:$0xff]  ;;  %v659_v31 = vmax.f32 %v651_v61, 0.0 }
  0x20   : > { %4048 = vmatmul.mubr.msk.f32.gmra.mrb[6].mxu0 %vm745_vm0, %v703_v25  ;;  %v4830_v25 = vld [vmem:[%s4738_s22 + $0x30] sm:$0xff]  ;;  %v665_v30 = vmin.f32 %v657_v24, 1.0 }
  0x21   : > { %4050 = vmatprep.mubr.msk.f32.mxu0 %vm745_vm0, %v704_v27  ;;  %v711_v27 = vld [vmem:[%s4644_s27 + $0x78] sm:$0xff]  ;;  %v718_v5 = vld [vmem:[%s4644_s27 + $0xb0] sm:$0xff] }
  0x24   : > { %4051 = vmatmul.mubr.msk.f32.gmra.mrb[8].mxu0 %vm745_vm0, %v705_v35  ;;  %v653_v35 = vsub.f32 %v4827_v12, %v4817_v8 }
  0x25   : > { %4053 = vmatprep.mubr.msk.f32.mxu0 %vm745_vm0, %v706_v42  ;;  %v713_v42 = vld [vmem:[%s4644_s27 + $0x88] sm:$0xff] }
  0x28   : > { %4054 = vmatmul.mubr.msk.f32.gmra.mrb[10].mxu0 %vm745_vm0, %v707_v50  ;;  %v654_v50 = vsub.f32 %v4830_v25, %v4820_v9 }
  0x29   : > { %4056 = vmatprep.mubr.msk.f32.mxu0 %vm745_vm0, %v708_v52  ;;  %v715_v52 = vld [vmem:[%s4644_s27 + $0x98] sm:$0xff] }
  0x2c   : > { %4057 = vmatmul.mubr.msk.f32.gmra.mrb[12].mxu0 %vm745_vm0, %v709_v63  ;;  %v4843_v63 = vld [vmem:[%s4738_s22 + $0x38] sm:$0xff] }
  0x2d   : > { %4059 = vmatprep.mubr.msk.f32.mxu0 %vm745_vm0, %v710_v3  ;;  %v712_v3 = vld [vmem:[%s4644_s27 + $0x80] sm:$0xff] }
  0x30   : > { %4060 = vmatmul.mubr.msk.f32.gmra.mrb[14].mxu0 %vm745_vm0, %v711_v27  ;;  %v719_v27 = vld [vmem:[%s4644_s27 + $0xb8] sm:$0xff] }
  0x31   : > { %4062 = vmatprep.mubr.msk.f32.mxu0 %vm745_vm0, %v712_v3  ;;  %v726_v3 = vld [vmem:[%s4897_s23 + $0x30] sm:$0xff] }
  0x34   : > { %4063 = vmatmul.mubr.msk.f32.gmra.mrb[16].mxu0 %vm745_vm0, %v713_v42  ;;  %v724_v42 = vld [vmem:[%s4897_s23 + $0x20] sm:$0xff] }
  0x35   : > { %4065 = vmatprep.mubr.msk.f32.mxu0 %vm745_vm0, %v714_v58  ;;  %v722_v58 = vld [vmem:[%s4897_s23 + $0x10] sm:$0xff] }
  0x38   : > { %4066 = vmatmul.mubr.msk.f32.gmra.mrb[18].mxu0 %vm745_vm0, %v715_v52  ;;  %v725_v52 = vld [vmem:[%s4897_s23 + $0x28] sm:$0xff] }
  0x39   : > { %4068 = vmatprep.mubr.msk.f32.mxu0 %vm745_vm0, %v716_v56  ;;  %v721_v56 = vld [vmem:[%s4897_s23 + $0x8] sm:$0xff] }
  0x3c   : > { %4069 = vmatmul.mubr.msk.f32.gmra.mrb[20].mxu0 %vm745_vm0, %v717_v47  ;;  %v720_v47 = vld [vmem:[%s4897_s23] sm:$0xff] }
  0x3d   : > { %4071 = vmatprep.mubr.msk.f32.mxu0 %vm745_vm0, %v718_v5  ;;  %v723_v5 = vld [vmem:[%s4897_s23 + $0x18] sm:$0xff] }
  0x40   : > { %4072 = vmatmul.mubr.msk.f32.gmra.mrb[22].mxu0 %vm745_vm0, %v719_v27  ;;  %v727_v27 = vld [vmem:[%s4897_s23 + $0x38] sm:$0xff] }
  0x41   : > { %4074 = vmatprep.mubr.msk.f32.mxu0 %vm745_vm0, %v4650_v2 }
  0x44   : > { %4075 = vmatmul.mubr.msk.f32.gmra.mrb[24].mxu0 %vm745_vm0, %v4672_v13  ;;  %v637_v13 = vmax.f32 %v629_v37, 0.0  ;;  %v661_v37 = vmax.f32 %v653_v35, 0.0  ;;  %v5755_v35 = vsub.f32 %v4770_v48, %v4782_v53  ;;  %v5758_v48 = vsub.f32 %v4799_v60, %v4809_v0 }
  0x45   : > { %4077 = vmatprep.mubr.msk.f32.mxu0 %vm745_vm0, %v4678_v15  ;;  %v638_v15 = vmax.f32 %v630_v39, 0.0  ;;  %v5761_v60 = vsub.f32 %v4823_v11, %v4843_v63 }
  0x47   : > { %v646_v20 = vmin.f32 %v638_v15, 1.0 }
  0x48   : > { %4078 = vmatmul.mubr.msk.f32.gmra.mrb[26].mxu0 %vm745_vm0, %v4692_v21  ;;  %v656_v21 = vmax.f32 %v648_v46, 0.0  ;;  %v5753_v46 = vsub.f32 %v4843_v63, %v4823_v11 }
  0x49   : > { %4080 = vmatprep.mubr.msk.f32.mxu0 %vm745_vm0, %v4705_v26 }
  0x4a   : > { %v664_v26 = vmin.f32 %v656_v21, 1.0  ;;  %v663_v55 = vmax.f32 %v5753_v46, 0.0 }
  0x4c   : > { %4081 = vmatmul.mubr.msk.f32.gmra.mrb[28].mxu0 %vm745_vm0, %v4729_v33  ;;  %v660_v33 = vmax.f32 %v652_v4, 0.0 }
  0x4d   : > { %4083 = vmatprep.mubr.msk.f32.mxu0 %vm745_vm0, %v4732_v34  ;;  %v667_v34 = vmin.f32 %v659_v31, 1.0 }
  0x4e   : > { %v668_v39 = vmin.f32 %v660_v33, 1.0 }
  0x50   : > { %4084 = vmatmul.mubr.msk.f32.gmra.mrb[30].mxu0 %vm745_vm0, %v4751_v40  ;;  %v662_v40 = vmax.f32 %v654_v50, 0.0  ;;  %v681_v50 = vmax.f32 %v5755_v35, 0.0 }
  0x51   : > { %4086 = vmatprep.mubr.msk.f32.mxu0 %vm745_vm0, %v4762_v45 }
  0x52   : > { %v670_v4 = vmin.f32 %v662_v40, 1.0 }
  0x54   : > { %4087 = vmatmul.mubr.msk.f32.gmra.mrb[32].mxu0 %vm745_vm0, %v4782_v53  ;;  %v684_v53 = vmax.f32 %v5758_v48, 0.0  ;;  %v1582_v48 = vld [vmem:[%s5745_s7] sm:$0xff] }
  0x55   : > { %4089 = vmatprep.mubr.msk.f32.mxu0 %vm745_vm0, %v4785_v54 }
  0x58   : > { %4090 = vmatmul.mubr.msk.f32.gmra.mrb[34].mxu0 %vm745_vm0, %v4796_v59 }
  0x59   : > { %4092 = vmatprep.mubr.msk.f32.mxu0 %vm745_vm0, %v4809_v0  ;;  %v687_v0 = vmax.f32 %v5761_v60, 0.0 }
  0x5c   : > { %4093 = vmatmul.mubr.msk.f32.gmra.mrb[36].mxu0 %vm745_vm0, %v4827_v12 }
  0x5d   : > { %4095 = vmatprep.mubr.msk.f32.mxu0 %vm745_vm0, %v4830_v25 }
  0x60   : > { %4096 = vmatmul.mubr.msk.f32.gmra.mrb[38].mxu0 %vm745_vm0, %v4843_v63 }
  0x61   : > { %4098 = vmatprep.mubr.msk.f32.mxu0 %vm745_vm0, %v720_v47  ;;  %v728_v47 = vld [vmem:[%s4897_s23 + $0x40] sm:$0xff] }
  0x64   : > { %4099 = vmatmul.mubr.msk.f32.gmra.mrb[40].mxu0 %vm745_vm0, %v721_v56  ;;  %v729_v56 = vld [vmem:[%s4897_s23 + $0x48] sm:$0xff] }
  0x65   : > { %4101 = vmatprep.mubr.msk.f32.mxu0 %vm745_vm0, %v722_v58  ;;  %v730_v58 = vld [vmem:[%s4897_s23 + $0x50] sm:$0xff] }
  0x68   : > { %4102 = vmatmul.mubr.msk.f32.gmra.mrb[42].mxu0 %vm745_vm0, %v723_v5  ;;  %v731_v5 = vld [vmem:[%s4897_s23 + $0x58] sm:$0xff] }
  0x69   : > { %4104 = vmatprep.mubr.msk.f32.mxu0 %vm745_vm0, %v724_v42  ;;  %v732_v42 = vld [vmem:[%s4897_s23 + $0x60] sm:$0xff] }
  0x6c   : > { %4105 = vmatmul.mubr.msk.f32.gmra.mrb[44].mxu0 %vm745_vm0, %v725_v52  ;;  %v733_v52 = vld [vmem:[%s4897_s23 + $0x68] sm:$0xff] }
  0x6d   : > { %4107 = vmatprep.mubr.msk.f32.mxu0 %vm745_vm0, %v726_v3  ;;  %v734_v3 = vld [vmem:[%s4897_s23 + $0x70] sm:$0xff] }
  0x70   : > { %4108 = vmatmul.mubr.msk.f32.gmra.mrb[46].mxu0 %vm745_vm0, %v727_v27  ;;  %v735_v27 = vld [vmem:[%s4897_s23 + $0x78] sm:$0xff] }
  0x71   : > { %4110 = vmatprep.mubr.msk.f32.mxu0 %vm745_vm0, %v728_v47  ;;  %v736_v47 = vld [vmem:[%s4897_s23 + $0x80] sm:$0xff] }
  0x74   : > { %4111 = vmatmul.mubr.msk.f32.gmra.mrb[48].mxu0 %vm745_vm0, %v729_v56  ;;  %v737_v56 = vld [vmem:[%s4897_s23 + $0x88] sm:$0xff] }
  0x75   : > { %4113 = vmatprep.mubr.msk.f32.mxu0 %vm745_vm0, %v730_v58  ;;  %v738_v58 = vld [vmem:[%s4897_s23 + $0x90] sm:$0xff] }
  0x78   : > { %4114 = vmatmul.mubr.msk.f32.gmra.mrb[50].mxu0 %vm745_vm0, %v731_v5  ;;  %v739_v5 = vld [vmem:[%s4897_s23 + $0x98] sm:$0xff] }
  0x79   : > { %4116 = vmatprep.mubr.msk.f32.mxu0 %vm745_vm0, %v732_v42  ;;  %v740_v42 = vld [vmem:[%s4897_s23 + $0xa0] sm:$0xff] }
  0x7c   : > { %4117 = vmatmul.mubr.msk.f32.gmra.mrb[52].mxu0 %vm745_vm0, %v733_v52  ;;  %v608_v52 = vmax.f32 %v600_v6, 0.0  ;;  %v611_v6 = vmax.f32 %v603_v23, 0.0  ;;  %v614_v23 = vmax.f32 %v606_v38, 0.0  ;;  %v633_v38 = vmax.f32 %v625_v17, 0.0 }
  0x7d   : > { %4119 = vmatprep.mubr.msk.f32.mxu0 %vm745_vm0, %v734_v3  ;;  %v741_v3 = vld [vmem:[%s4897_s23 + $0xa8] sm:$0xff]  ;;  %v645_v17 = vmin.f32 %v637_v13, 1.0 }
  0x80   : > { %4120 = vmatmul.mubr.msk.f32.gmra.mrb[54].mxu0 %vm745_vm0, %v735_v27  ;;  %v742_v27 = vld [vmem:[%s4897_s23 + $0xb0] sm:$0xff] }
  0x81   : > { %4122 = vmatprep.mubr.msk.f32.mxu0 %vm745_vm0, %v736_v47  ;;  %v609_v47 = vmax.f32 %v601_v16, 0.0  ;;  %v612_v16 = vmax.f32 %v604_v28, 0.0  ;;  %v615_v28 = vmax.f32 %v607_v43, 0.0  ;;  %v634_v43 = vmax.f32 %v626_v19, 0.0 }
  0x82   : > { %v639_v19 = vmax.f32 %v631_v44, 0.0  ;;  %v669_v44 = vmin.f32 %v661_v37, 1.0 }
  0x83   : > { %v617_v62 = vmin.f32 %v609_v47, 1.0  ;;  %v622_v47 = vmin.f32 %v614_v23, 1.0  ;;  %v642_v2 = vmin.f32 %v634_v43, 1.0  ;;  %v692_v23 = vmin.f32 %v684_v53, 1.0 }
  0x84   : > { %4123 = vmatmul.mubr.msk.f32.gmra.mrb[56].mxu0 %vm745_vm0, %v737_v56  ;;  %v616_v56 = vmin.f32 %v608_v52, 1.0  ;;  %v619_v52 = vmin.f32 %v611_v6, 1.0  ;;  %v647_v22 = vmin.f32 %v639_v19, 1.0 }
  0x85   : > { %4125 = vmatprep.mubr.msk.f32.mxu0 %vm745_vm0, %v738_v58  ;;  %v610_v58 = vmax.f32 %v602_v18, 0.0  ;;  %v613_v18 = vmax.f32 %v605_v36, 0.0  ;;  %v632_v36 = vmax.f32 %v624_v7, 0.0  ;;  %v636_v7 = vmax.f32 %v628_v29, 0.0 }
  0x86   : > { %v658_v29 = vmax.f32 %v650_v57, 0.0  ;;  %v5754_v57 = vsub.f32 %v4754_v41, %v4762_v45  ;;  %v5757_v41 = vsub.f32 %v4778_v51, %v4796_v59  ;;  %v5760_v51 = vsub.f32 %v4820_v9, %v4830_v25 }
  0x87   : > { %v644_v14 = vmin.f32 %v636_v7, 1.0 }
  0x88   : > { %4126 = vmatmul.mubr.msk.f32.gmra.mrb[58].mxu0 %vm745_vm0, %v739_v5  ;;  %v743_v5 = vld [vmem:[%s4897_s23 + $0xb8] sm:$0xff]  ;;  %v666_v32 = vmin.f32 %v658_v29, 1.0  ;;  %v680_v61 = vmax.f32 %v5754_v57, 0.0  ;;  %v683_v45 = vmax.f32 %v5757_v41, 0.0  ;;  %v686_v59 = vmax.f32 %v5760_v51, 0.0 }
  0x89   : > { %4128 = vmatprep.mubr.msk.f32.mxu0 %vm745_vm0, %v740_v42  ;;  %v618_v42 = vmin.f32 %v610_v58, 1.0  ;;  %v641_v58 = vmin.f32 %v633_v38, 1.0 }
  0x8a   : > { %v688_v6 = vmin.f32 %v680_v61, 1.0 }
  0x8c   : > { %4129 = vmatmul.mubr.msk.f32.gmra.mrb[60].mxu0 %vm745_vm0, %v741_v3  ;;  %v620_v3 = vmin.f32 %v612_v16, 1.0 }
  0x8d   : > { %4131 = vmatprep.mubr.msk.f32.mxu0 %vm745_vm0, %v742_v27  ;;  %v621_v27 = vmin.f32 %v613_v18, 1.0 }
  0x90   : > { %4132 = vmatmul.mubr.msk.f32.gmra.mrb[62].mxu0 %vm745_vm0, %v743_v5  ;;  %v671_v5 = vmin.f32 %v663_v55, 1.0 }
  0x91   : > { %4134 = vmatprep.mubr.msk.f32.mxu0 %vm745_vm0, %v616_v56  ;;  %v640_v56 = vmin.f32 %v632_v36, 1.0 }
  0x94   : > { %4135 = vmatmul.mubr.msk.f32.gmra.mrb[64].mxu0 %vm745_vm0, %v617_v62  ;;  %v623_v62 = vmin.f32 %v615_v28, 1.0  ;;  %v694_v28 = vmin.f32 %v686_v59, 1.0  ;;  %v1595_v59 = vld [vmem:[%s5745_s7 + $0x68] sm:$0xff] }
  0x95   : > { %4137 = vmatprep.mubr.msk.f32.mxu0 %vm745_vm0, %v618_v42  ;;  %v5756_v42 = vsub.f32 %v4773_v49, %v4785_v54  ;;  %v5759_v49 = vsub.f32 %v4817_v8, %v4827_v12  ;;  %v1583_v8 = vld [vmem:[%s5745_s7 + $0x8] sm:$0xff]  ;;  %v695_v12 = vmin.f32 %v687_v0, 1.0  ;;  %v1594_v0 = vld [vmem:[%s5745_s7 + $0x60] sm:$0xff] }
  0x96   : > { %1682 = vmatprep.mubr.f32.mxu1 %v1583_v8  ;;  %v1601_v8 = vld [vmem:[%s5745_s7 + $0x98] sm:$0xff] }
  0x97   : > { %v682_v16 = vmax.f32 %v5756_v42, 0.0  ;;  %v685_v54 = vmax.f32 %v5759_v49, 0.0 }
  0x98   : > { %4138 = vmatmul.mubr.msk.f32.gmra.mrb[66].mxu0 %vm745_vm0, %v619_v52  ;;  %v689_v52 = vmin.f32 %v681_v50, 1.0 }
  0x99   : > { %4140 = vmatprep.mubr.msk.f32.mxu0 %vm745_vm0, %v620_v3  ;;  %v690_v18 = vmin.f32 %v682_v16, 1.0  ;;  %v691_v3 = vmin.f32 %v683_v45, 1.0 }
  0x9c   : > { %4141 = vmatmul.mubr.msk.f32.gmra.mrb[68].mxu0 %vm745_vm0, %v621_v27  ;;  %v693_v27 = vmin.f32 %v685_v54, 1.0 }
  0x9d   : > { %4143 = vmatprep.mubr.msk.f32.mxu0 %vm745_vm0, %v622_v47 }
  0xa0   : > { %4144 = vmatmul.mubr.msk.f32.gmra.mrb[70].mxu0 %vm745_vm0, %v623_v62 }
  0xa1   : > { %4146 = vmatprep.mubr.msk.f32.mxu0 %vm745_vm0, %v640_v56 }
  0xa4   : > { %4147 = vmatmul.mubr.msk.f32.gmra.mrb[72].mxu0 %vm745_vm0, %v641_v58 }
  0xa5   : > { %4149 = vmatprep.mubr.msk.f32.mxu0 %vm745_vm0, %v642_v2 }
  0xa8   : > { %4150 = vmatmul.mubr.msk.f32.gmra.mrb[74].mxu0 %vm745_vm0, %v643_v10 }
  0xa9   : > { %4152 = vmatprep.mubr.msk.f32.mxu0 %vm745_vm0, %v644_v14 }
  0xac   : > { %4153 = vmatmul.mubr.msk.f32.gmra.mrb[76].mxu0 %vm745_vm0, %v645_v17 }
  0xad   : > { %4155 = vmatprep.mubr.msk.f32.mxu0 %vm745_vm0, %v646_v20 }
  0xb0   : > { %4156 = vmatmul.mubr.msk.f32.gmra.mrb[78].mxu0 %vm745_vm0, %v647_v22 }
  0xb1   : > { %4158 = vmatprep.mubr.msk.f32.mxu0 %vm745_vm0, %v664_v26 }
  0xb4   : > { %4159 = vmatmul.mubr.msk.f32.gmra.mrb[80].mxu0 %vm745_vm0, %v665_v30 }
  0xb5   : > { %4161 = vmatprep.mubr.msk.f32.mxu0 %vm745_vm0, %v666_v32 }
  0xb8   : > { %4162 = vmatmul.mubr.msk.f32.gmra.mrb[82].mxu0 %vm745_vm0, %v667_v34 }
  0xb9   : > { %4164 = vmatprep.mubr.msk.f32.mxu0 %vm745_vm0, %v668_v39 }
  0xbc   : > { %4165 = vmatmul.mubr.msk.f32.gmra.mrb[84].mxu0 %vm745_vm0, %v669_v44 }
  0xbd   : > { %4167 = vmatprep.mubr.msk.f32.mxu0 %vm745_vm0, %v670_v4 }
  0xc0   : > { %4168 = vmatmul.mubr.msk.f32.gmra.mrb[86].mxu0 %vm745_vm0, %v671_v5 }
  0xc1   : > { %4170 = vmatprep.mubr.msk.f32.mxu0 %vm745_vm0, %v688_v6 }
  0xc4   : > { %4171 = vmatmul.mubr.msk.f32.gmra.mrb[88].mxu0 %vm745_vm0, %v689_v52 }
  0xc5   : > { %4173 = vmatprep.mubr.msk.f32.mxu0 %vm745_vm0, %v690_v18 }
  0xc8   : > { %4174 = vmatmul.mubr.msk.f32.gmra.mrb[90].mxu0 %vm745_vm0, %v691_v3  ;;  %v1589_v3 = vld [vmem:[%s5745_s7 + $0x38] sm:$0xff] }
  0xc9   : > { %4176 = vmatprep.mubr.msk.f32.mxu0 %vm745_vm0, %v692_v23  ;;  %v1588_v23 = vld [vmem:[%s5745_s7 + $0x30] sm:$0xff] }
  0xcc   : > { %4177 = vmatmul.mubr.msk.f32.gmra.mrb[92].mxu0 %vm745_vm0, %v693_v27 }
  0xcd   : > { %4179 = vmatprep.mubr.msk.f32.mxu0 %vm745_vm0, %v694_v28 }
  0xd0   : > { %4180 = vmatmul.mubr.msk.f32.gmra.mrb[94].mxu0 %vm745_vm0, %v695_v12 }
  0xe7   : > { %v4040_v9 = vpop.f32.mrb[0].mxu0 }
  0xe8   : > { %v1103_v11 = vpop.f32.mrb[1].mxu0 }
  0xe9   : > { %v4303_v25 = vpack.c.bf16 %v4040_v9, %v1103_v11  ;;  %v1600_v11 = vld [vmem:[%s5745_s7 + $0x90] sm:$0xff] }
  0xeb   : > { %v4043_v63 = vpop.f32.mrb[2].mxu0 }
  0xec   : > { %v1113_v36 = vpop.f32.mrb[3].mxu0 }
  0xed   : > { %v4307_v47 = vpack.c.bf16 %v4043_v63, %v1113_v36  ;;  %v1607_v63 = vld [vmem:[%s5745_s7 + $0xc8] sm:$0xff] }
  0xef   : > { %v4046_v38 = vpop.f32.mrb[4].mxu0 }
  0xf0   : > { %v1123_v62 = vpop.f32.mrb[5].mxu0 }
  0xf1   : > { %v4311_v56 = vpack.c.bf16 %v4046_v38, %v1123_v62  ;;  %v1606_v38 = vld [vmem:[%s5745_s7 + $0xc0] sm:$0xff] }
  0xf3   : > { %v4049_v43 = vpop.f32.mrb[6].mxu0 }
  0xf4   : > { %v1133_v58 = vpop.f32.mrb[7].mxu0 }
  0xf5   : > { %v4315_v1 = vpack.c.bf16 %v4049_v43, %v1133_v58 }
  0xf7   : > { %v4052_v2 = vpop.f32.mrb[8].mxu0 }
  0xf8   : > { %v1143_v7 = vpop.f32.mrb[9].mxu0 }
  0xf9   : > { %v4319_v10 = vpack.c.bf16 %v4052_v2, %v1143_v7  ;;  %v1585_v7 = vld [vmem:[%s5745_s7 + $0x18] sm:$0xff] }
  0xfb   : > { %v4055_v13 = vpop.f32.mrb[10].mxu0 }
  0xfc   : > { %v1153_v14 = vpop.f32.mrb[11].mxu0 }
  0xfd   : > { %v4323_v15 = vpack.c.bf16 %v4055_v13, %v1153_v14 }
  0xff   : > { %v4058_v17 = vpop.f32.mrb[12].mxu0 }
 0x100   : > { %v1163_v19 = vpop.f32.mrb[13].mxu0 }
 0x101   : > { %v4327_v20 = vpack.c.bf16 %v4058_v17, %v1163_v19 }
 0x103   : > { %v4061_v21 = vpop.f32.mrb[14].mxu0 }
 0x104   : > { %v1173_v22 = vpop.f32.mrb[15].mxu0 }
 0x105   : > { %v4331_v24 = vpack.c.bf16 %v4061_v21, %v1173_v22 }
 0x107   : > { %v4064_v26 = vpop.f32.mrb[16].mxu0 }
 0x108   : > { %v1183_v29 = vpop.f32.mrb[17].mxu0 }
 0x109   : > { %v4301_v30 = vpack.c.bf16 %v4064_v26, %v1183_v29 }
 0x10b   : > { %v4067_v31 = vpop.f32.mrb[18].mxu0  ;;  %4302 = vmatprep.subr.bf16.mxu1 %v4301_v30 }
 0x10c   : > { %v1193_v32 = vpop.f32.mrb[19].mxu0  ;;  %4304 = vmatpush3.bf16.msra.mxu1 %v4303_v25 }
 0x10d   : > { %v4305_v33 = vpack.c.bf16 %v4067_v31, %v1193_v32 }
 0x10f   : > { %v4070_v34 = vpop.f32.mrb[20].mxu0  ;;  %4306 = vmatprep.subr.bf16.mxu1 %v4305_v33 }
 0x110   : > { %v1203_v37 = vpop.f32.mrb[21].mxu0  ;;  %4308 = vmatpush3.bf16.msra.mxu1 %v4307_v47 }
 0x111   : > { %v4309_v39 = vpack.c.bf16 %v4070_v34, %v1203_v37 }
 0x113   : > { %v4073_v40 = vpop.f32.mrb[22].mxu0  ;;  %4310 = vmatprep.subr.bf16.mxu1 %v4309_v39 }
 0x114   : > { %v1213_v44 = vpop.f32.mrb[23].mxu0  ;;  %4312 = vmatpush3.bf16.msra.mxu1 %v4311_v56  ;;  %v1613_v56 = vld [vmem:[%s5745_s7 + $0xf8] sm:$0xff] }
 0x115   : > { %v4313_v46 = vpack.c.bf16 %v4073_v40, %v1213_v44 }
 0x117   : > { %v4076_v55 = vpop.f32.mrb[24].mxu0  ;;  %4314 = vmatprep.subr.bf16.mxu1 %v4313_v46 }
 0x118   : > { %v1223_v57 = vpop.f32.mrb[25].mxu0  ;;  %4316 = vmatpush3.bf16.msra.mxu1 %v4315_v1  ;;  %v1612_v1 = vld [vmem:[%s5745_s7 + $0xf0] sm:$0xff] }
 0x119   : > { %v4317_v61 = vpack.c.bf16 %v4076_v55, %v1223_v57 }
 0x11b   : > { %v4079_v4 = vpop.f32.mrb[26].mxu0  ;;  %4318 = vmatprep.subr.bf16.mxu1 %v4317_v61 }
 0x11c   : > { %v1233_v35 = vpop.f32.mrb[27].mxu0  ;;  %4320 = vmatpush3.bf16.msra.mxu1 %v4319_v10 }
 0x11d   : > { %v4321_v50 = vpack.c.bf16 %v4079_v4, %v1233_v35 }
 0x11f   : > { %v4082_v5 = vpop.f32.mrb[28].mxu0  ;;  %4322 = vmatprep.subr.bf16.mxu1 %v4321_v50 }
 0x120   : > { %v1243_v6 = vpop.f32.mrb[29].mxu0  ;;  %4324 = vmatpush3.bf16.msra.mxu1 %v4323_v15 }
 0x121   : > { %v4325_v42 = vpack.c.bf16 %v4082_v5, %v1243_v6 }
 0x123   : > { %v4085_v16 = vpop.f32.mrb[30].mxu0  ;;  %4326 = vmatprep.subr.bf16.mxu1 %v4325_v42 }
 0x124   : > { %v1253_v52 = vpop.f32.mrb[31].mxu0  ;;  %4328 = vmatpush3.bf16.msra.mxu1 %v4327_v20 }
 0x125   : > { %v4329_v41 = vpack.c.bf16 %v4085_v16, %v1253_v52  ;;  %v1584_v52 = vld [vmem:[%s5745_s7 + $0x10] sm:$0xff] }
 0x127   : > { %v4088_v45 = vpop.f32.mrb[32].mxu0  ;;  %4330 = vmatprep.subr.bf16.mxu1 %v4329_v41 }
 0x128   : > { %v1263_v18 = vpop.f32.mrb[33].mxu0  ;;  %4332 = vmatpush3.bf16.msra.mxu1 %v4331_v24 }
 0x129   : > { %v4335_v53 = vpack.c.bf16 %v4088_v45, %v1263_v18  ;;  %v1591_v45 = vld [vmem:[%s5745_s7 + $0x48] sm:$0xff] }
 0x12b   : > { %v4091_v49 = vpop.f32.mrb[34].mxu0  ;;  %1683 = vmatmul.mubr.f32.vlgmr.msra.gmra.mrb[0].mxu1 %v1582_v48 }
 0x12c   : > { %v1273_v54 = vpop.f32.mrb[35].mxu0  ;;  %1687 = vmatprep.mubr.f32.mxu1 %v1589_v3 }
 0x12d   : > { %v4339_v51 = vpack.c.bf16 %v4091_v49, %v1273_v54  ;;  %v1597_v49 = vld [vmem:[%s5745_s7 + $0x78] sm:$0xff] }
 0x12f   : > { %v4094_v27 = vpop.f32.mrb[36].mxu0  ;;  %1688 = vmatmul.mubr.f32.gmra.mrb[2].mxu1 %v1588_v23 }
 0x130   : > { %v1283_v60 = vpop.f32.mrb[37].mxu0  ;;  %1692 = vmatprep.mubr.f32.mxu1 %v1595_v59 }
 0x131   : > { %v4343_v28 = vpack.c.bf16 %v4094_v27, %v1283_v60  ;;  %v1603_v27 = vld [vmem:[%s5745_s7 + $0xa8] sm:$0xff] }
 0x133   : > { %v4097_v12 = vpop.f32.mrb[38].mxu0  ;;  %1693 = vmatmul.mubr.f32.gmra.mrb[4].mxu1 %v1594_v0 }
 0x134   : > { %v1293_v9 = vpop.f32.mrb[39].mxu0  ;;  %1697 = vmatprep.mubr.f32.mxu1 %v1601_v8 }
 0x135   : > { %v4347_v25 = vpack.c.bf16 %v4097_v12, %v1293_v9  ;;  %v1609_v12 = vld [vmem:[%s5745_s7 + $0xd8] sm:$0xff] }
 0x137   : > { %v4100_v36 = vpop.f32.mrb[40].mxu0  ;;  %1698 = vmatmul.mubr.f32.gmra.mrb[6].mxu1 %v1600_v11 }
 0x138   : > { %v1303_v47 = vpop.f32.mrb[41].mxu0  ;;  %1702 = vmatprep.mubr.f32.mxu1 %v1607_v63 }
 0x139   : > { %v4351_v62 = vpack.c.bf16 %v4100_v36, %v1303_v47  ;;  %v1615_v36 = vld [vmem:[%s5745_s7 + $0x108] sm:$0xff] }
 0x13b   : > { %v4103_v43 = vpop.f32.mrb[42].mxu0  ;;  %1703 = vmatmul.mubr.f32.gmra.mrb[8].mxu1 %v1606_v38 }
 0x13c   : > { %v1313_v58 = vpop.f32.mrb[43].mxu0  ;;  %1707 = vmatprep.mubr.f32.mxu1 %v1613_v56 }
 0x13d   : > { %v4355_v2 = vpack.c.bf16 %v4103_v43, %v1313_v58  ;;  %v1587_v43 = vld [vmem:[%s5745_s7 + $0x28] sm:$0xff] }
 0x13f   : > { %v4106_v10 = vpop.f32.mrb[44].mxu0  ;;  %1708 = vmatmul.mubr.f32.gmra.mrb[10].mxu1 %v1612_v1 }
 0x140   : > { %v1323_v13 = vpop.f32.mrb[45].mxu0  ;;  %1777 = vmatprep.mubr.f32.mxu1 %v1585_v7 }
 0x141   : > { %v4359_v14 = vpack.c.bf16 %v4106_v10, %v1323_v13 }
 0x143   : > { %v4109_v15 = vpop.f32.mrb[46].mxu0 }
 0x144   : > { %v1333_v17 = vpop.f32.mrb[47].mxu0 }
 0x145   : > { %v4363_v19 = vpack.c.bf16 %v4109_v15, %v1333_v17 }
 0x147   : > { %v4112_v20 = vpop.f32.mrb[48].mxu0 }
 0x148   : > { %v1343_v21 = vpop.f32.mrb[49].mxu0 }
 0x149   : > { %v4333_v22 = vpack.c.bf16 %v4112_v20, %v1343_v21 }
 0x14b   : > { %v4115_v24 = vpop.f32.mrb[50].mxu0  ;;  %4334 = vmatprep.subr.bf16.mxu1 %v4333_v22 }
 0x14c   : > { %v1353_v26 = vpop.f32.mrb[51].mxu0  ;;  %4336 = vmatpush3.bf16.msra.mxu1 %v4335_v53  ;;  %v1590_v53 = vld [vmem:[%s5745_s7 + $0x40] sm:$0xff] }
 0x14d   : > { %v4337_v29 = vpack.c.bf16 %v4115_v24, %v1353_v26 }
 0x14f   : > { %v4118_v30 = vpop.f32.mrb[52].mxu0  ;;  %4338 = vmatprep.subr.bf16.mxu1 %v4337_v29 }
 0x150   : > { %v1363_v31 = vpop.f32.mrb[53].mxu0  ;;  %4340 = vmatpush3.bf16.msra.mxu1 %v4339_v51  ;;  %v1596_v51 = vld [vmem:[%s5745_s7 + $0x70] sm:$0xff] }
 0x151   : > { %v4341_v32 = vpack.c.bf16 %v4118_v30, %v1363_v31 }
 0x153   : > { %v4121_v33 = vpop.f32.mrb[54].mxu0  ;;  %4342 = vmatprep.subr.bf16.mxu1 %v4341_v32 }
 0x154   : > { %v1373_v34 = vpop.f32.mrb[55].mxu0  ;;  %4344 = vmatpush3.bf16.msra.mxu1 %v4343_v28  ;;  %v1602_v28 = vld [vmem:[%s5745_s7 + $0xa0] sm:$0xff] }
 0x155   : > { %v4345_v37 = vpack.c.bf16 %v4121_v33, %v1373_v34 }
 0x157   : > { %v4124_v39 = vpop.f32.mrb[56].mxu0  ;;  %4346 = vmatprep.subr.bf16.mxu1 %v4345_v37 }
 0x158   : > { %v1383_v40 = vpop.f32.mrb[57].mxu0  ;;  %4348 = vmatpush3.bf16.msra.mxu1 %v4347_v25  ;;  %v1608_v25 = vld [vmem:[%s5745_s7 + $0xd0] sm:$0xff] }
 0x159   : > { %v4349_v44 = vpack.c.bf16 %v4124_v39, %v1383_v40 }
 0x15b   : > { %v4127_v46 = vpop.f32.mrb[58].mxu0  ;;  %4350 = vmatprep.subr.bf16.mxu1 %v4349_v44 }
 0x15c   : > { %v1393_v55 = vpop.f32.mrb[59].mxu0  ;;  %4352 = vmatpush3.bf16.msra.mxu1 %v4351_v62  ;;  %v1614_v62 = vld [vmem:[%s5745_s7 + $0x100] sm:$0xff] }
 0x15d   : > { %v4353_v57 = vpack.c.bf16 %v4127_v46, %v1393_v55 }
 0x15f   : > { %v4130_v61 = vpop.f32.mrb[60].mxu0  ;;  %4354 = vmatprep.subr.bf16.mxu1 %v4353_v57 }
 0x160   : > { %v1403_v4 = vpop.f32.mrb[61].mxu0  ;;  %4356 = vmatpush3.bf16.msra.mxu1 %v4355_v2 }
 0x161   : > { %v4357_v35 = vpack.c.bf16 %v4130_v61, %v1403_v4 }
 0x163   : > { %v4133_v50 = vpop.f32.mrb[62].mxu0  ;;  %4358 = vmatprep.subr.bf16.mxu1 %v4357_v35  ;;  %v1586_v35 = vld [vmem:[%s5745_s7 + $0x20] sm:$0xff] }
 0x164   : > { %v1413_v5 = vpop.f32.mrb[63].mxu0  ;;  %4360 = vmatpush3.bf16.msra.mxu1 %v4359_v14 }
 0x165   : > { %v4361_v6 = vpack.c.bf16 %v4133_v50, %v1413_v5  ;;  %v1593_v50 = vld [vmem:[%s5745_s7 + $0x58] sm:$0xff]  ;;  %v1592_v5 = vld [vmem:[%s5745_s7 + $0x50] sm:$0xff] }
 0x167   : > { %v4136_v42 = vpop.f32.mrb[64].mxu0  ;;  %4362 = vmatprep.subr.bf16.mxu1 %v4361_v6  ;;  %v1599_v6 = vld [vmem:[%s5745_s7 + $0x88] sm:$0xff] }
 0x168   : > { %v1423_v16 = vpop.f32.mrb[65].mxu0  ;;  %4364 = vmatpush3.bf16.msra.mxu1 %v4363_v19 }
 0x169   : > { %v4367_v41 = vpack.c.bf16 %v4136_v42, %v1423_v16  ;;  %v1598_v42 = vld [vmem:[%s5745_s7 + $0x80] sm:$0xff]  ;;  %v1605_v16 = vld [vmem:[%s5745_s7 + $0xb8] sm:$0xff] }
 0x16b   : > { %v4139_v18 = vpop.f32.mrb[66].mxu0  ;;  %1778 = vmatmul.mubr.f32.vlgmr.msra.gmra.mrb[12].mxu1 %v1584_v52  ;;  %v1604_v52 = vld [vmem:[%s5745_s7 + $0xb0] sm:$0xff] }
 0x16c   : > { %v1433_v48 = vpop.f32.mrb[67].mxu0  ;;  %1782 = vmatprep.mubr.f32.mxu1 %v1591_v45  ;;  %v1610_v45 = vld [vmem:[%s5745_s7 + $0xe0] sm:$0xff] }
 0x16d   : > { %v4371_v3 = vpack.c.bf16 %v4139_v18, %v1433_v48  ;;  %v1617_v18 = vld [vmem:[%s5745_s7 + $0x118] sm:$0xff]  ;;  %v1616_v48 = vld [vmem:[%s5745_s7 + $0x110] sm:$0xff] }
 0x16f   : > { %v4142_v54 = vpop.f32.mrb[68].mxu0  ;;  %1783 = vmatmul.mubr.f32.gmra.mrb[14].mxu1 %v1590_v53 }
 0x170   : > { %v1443_v23 = vpop.f32.mrb[69].mxu0  ;;  %1787 = vmatprep.mubr.f32.mxu1 %v1597_v49 }
 0x171   : > { %v4375_v59 = vpack.c.bf16 %v4142_v54, %v1443_v23 }
 0x173   : > { %v4145_v60 = vpop.f32.mrb[70].mxu0  ;;  %1788 = vmatmul.mubr.f32.gmra.mrb[16].mxu1 %v1596_v51 }
 0x174   : > { %v1453_v0 = vpop.f32.mrb[71].mxu0  ;;  %1792 = vmatprep.mubr.f32.mxu1 %v1603_v27 }
 0x175   : > { %v4379_v8 = vpack.c.bf16 %v4145_v60, %v1453_v0 }
 0x177   : > { %v4148_v9 = vpop.f32.mrb[72].mxu0  ;;  %1793 = vmatmul.mubr.f32.gmra.mrb[18].mxu1 %v1602_v28 }
 0x178   : > { %v1463_v11 = vpop.f32.mrb[73].mxu0  ;;  %1797 = vmatprep.mubr.f32.mxu1 %v1609_v12 }
 0x179   : > { %v4383_v63 = vpack.c.bf16 %v4148_v9, %v1463_v11 }
 0x17b   : > { %v4151_v47 = vpop.f32.mrb[74].mxu0  ;;  %1798 = vmatmul.mubr.f32.gmra.mrb[20].mxu1 %v1608_v25 }
 0x17c   : > { %v1473_v38 = vpop.f32.mrb[75].mxu0  ;;  %1802 = vmatprep.mubr.f32.mxu1 %v1615_v36 }
 0x17d   : > { %v4387_v56 = vpack.c.bf16 %v4151_v47, %v1473_v38 }
 0x17f   : > { %v4154_v58 = vpop.f32.mrb[76].mxu0  ;;  %1803 = vmatmul.mubr.f32.gmra.mrb[22].mxu1 %v1614_v62 }
 0x180   : > { %v1483_v1 = vpop.f32.mrb[77].mxu0  ;;  %1872 = vmatprep.mubr.f32.mxu1 %v1587_v43 }
 0x181   : > { %v4391_v2 = vpack.c.bf16 %v4154_v58, %v1483_v1 }
 0x183   : > { %v4157_v7 = vpop.f32.mrb[78].mxu0 }
 0x184   : > { %v1493_v10 = vpop.f32.mrb[79].mxu0 }
 0x185   : > { %v4395_v13 = vpack.c.bf16 %v4157_v7, %v1493_v10 }
 0x187   : > { %v4160_v14 = vpop.f32.mrb[80].mxu0 }
 0x188   : > { %v1503_v15 = vpop.f32.mrb[81].mxu0 }
 0x189   : > { %v4365_v17 = vpack.c.bf16 %v4160_v14, %v1503_v15 }
 0x18b   : > { %v4163_v19 = vpop.f32.mrb[82].mxu0  ;;  %4366 = vmatprep.subr.bf16.mxu1 %v4365_v17 }
 0x18c   : > { %v1513_v20 = vpop.f32.mrb[83].mxu0  ;;  %4368 = vmatpush3.bf16.msra.mxu1 %v4367_v41  ;;  %v1611_v41 = vld [vmem:[%s5745_s7 + $0xe8] sm:$0xff] }
 0x18d   : > { %v4369_v21 = vpack.c.bf16 %v4163_v19, %v1513_v20 }
 0x18f   : > { %v4166_v22 = vpop.f32.mrb[84].mxu0  ;;  %4370 = vmatprep.subr.bf16.mxu1 %v4369_v21 }
 0x190   : > { %v1523_v24 = vpop.f32.mrb[85].mxu0  ;;  %4372 = vmatpush3.bf16.msra.mxu1 %v4371_v3 }
 0x191   : > { %v4373_v26 = vpack.c.bf16 %v4166_v22, %v1523_v24 }
 0x193   : > { %v4169_v29 = vpop.f32.mrb[86].mxu0  ;;  %4374 = vmatprep.subr.bf16.mxu1 %v4373_v26 }
 0x194   : > { %v1533_v30 = vpop.f32.mrb[87].mxu0  ;;  %4376 = vmatpush3.bf16.msra.mxu1 %v4375_v59 }
 0x195   : > { %v4377_v31 = vpack.c.bf16 %v4169_v29, %v1533_v30 }
 0x197   : > { %v4172_v32 = vpop.f32.mrb[88].mxu0  ;;  %4378 = vmatprep.subr.bf16.mxu1 %v4377_v31 }
 0x198   : > { %v1543_v33 = vpop.f32.mrb[89].mxu0  ;;  %4380 = vmatpush3.bf16.msra.mxu1 %v4379_v8 }
 0x199   : > { %v4381_v34 = vpack.c.bf16 %v4172_v32, %v1543_v33 }
 0x19b   : > { %v4175_v37 = vpop.f32.mrb[90].mxu0  ;;  %4382 = vmatprep.subr.bf16.mxu1 %v4381_v34 }
 0x19c   : > { %v1553_v39 = vpop.f32.mrb[91].mxu0  ;;  %4384 = vmatpush3.bf16.msra.mxu1 %v4383_v63 }
 0x19d   : > { %v4385_v40 = vpack.c.bf16 %v4175_v37, %v1553_v39 }
 0x19f   : > { %v4178_v44 = vpop.f32.mrb[92].mxu0  ;;  %4386 = vmatprep.subr.bf16.mxu1 %v4385_v40 }
 0x1a0   : > { %v1563_v46 = vpop.f32.mrb[93].mxu0  ;;  %4388 = vmatpush3.bf16.msra.mxu1 %v4387_v56 }
 0x1a1   : > { %v4389_v55 = vpack.c.bf16 %v4178_v44, %v1563_v46 }
 0x1a3   : > { %v4181_v57 = vpop.f32.mrb[94].mxu0  ;;  %4390 = vmatprep.subr.bf16.mxu1 %v4389_v55 }
 0x1a4   : > { %v1573_v61 = vpop.f32.mrb[95].mxu0  ;;  %4392 = vmatpush3.bf16.msra.mxu1 %v4391_v2 }
 0x1a5   : > { %v4393_v4 = vpack.c.bf16 %v4181_v57, %v1573_v61 }
 0x1a7   : > { %4394 = vmatprep.subr.bf16.mxu1 %v4393_v4 }
 0x1a8   : > { %4396 = vmatpush3.bf16.msra.mxu1 %v4395_v13 }
 0x1ab   : > { %1873 = vmatmul.mubr.f32.vlgmr.msra.gmra.mrb[24].mxu1 %v1586_v35 }
 0x1ac   : > { %1877 = vmatprep.mubr.f32.mxu1 %v1593_v50 }
 0x1af   : > { %1878 = vmatmul.mubr.f32.gmra.mrb[26].mxu1 %v1592_v5 }
 0x1b0   : > { %1882 = vmatprep.mubr.f32.mxu1 %v1599_v6 }
 0x1b3   : > { %1883 = vmatmul.mubr.f32.gmra.mrb[28].mxu1 %v1598_v42 }
 0x1b4   : > { %1887 = vmatprep.mubr.f32.mxu1 %v1605_v16 }
 0x1b7   : > { %1888 = vmatmul.mubr.f32.gmra.mrb[30].mxu1 %v1604_v52 }
 0x1b8   : > { %1892 = vmatprep.mubr.f32.mxu1 %v1611_v41 }
 0x1bb   : > { %1893 = vmatmul.mubr.f32.gmra.mrb[32].mxu1 %v1610_v45 }
 0x1bc   : > { %1897 = vmatprep.mubr.f32.mxu1 %v1617_v18 }
 0x1bf   : > { %1898 = vmatmul.mubr.f32.gmra.mrb[34].mxu1 %v1616_v48 }
 0x1fe   : > { %v3845_v53 = vpop.f32.mrb[0].mxu1 }
 0x1ff   : > { %v3846_v3 = vpop.f32.mrb[1].mxu1 }
 0x200   : > { %v3847_v49 = vadd.f32 %v3846_v3, %v3845_v53 }
 0x202   : > { %v3848_v54 = vpop.f32.mrb[2].mxu1 }
 0x203   : > { %v3849_v23 = vpop.f32.mrb[3].mxu1 }
 0x204   : > { %v3850_v51 = vadd.f32 %v3849_v23, %v3848_v54 }
 0x206   : > { %v3851_v59 = vpop.f32.mrb[4].mxu1 }
 0x207   : > { %v3852_v27 = vpop.f32.mrb[5].mxu1 }
 0x208   : > { %v3853_v60 = vadd.f32 %v3852_v27, %v3851_v59 }
 0x20a   : > { %v3854_v0 = vpop.f32.mrb[6].mxu1 }
 0x20b   : > { %v3855_v28 = vpop.f32.mrb[7].mxu1 }
 0x20c   : > { %v3856_v8 = vadd.f32 %v3855_v28, %v3854_v0  ;;  %v4528_v0 = vmov 0   ;;  %v2007_v28 = vld [vmem:[%s5747_s9 + $0x88] sm:$0xff] }
 0x20d   : > { %4459 = vset.pattern.permute.xlu1 %v4528_v0  ;;  %4458 = vset.pattern.permute.xlu0 %v4528_v0  ;;  %v1947_v0 = vld [vmem:[%s5746_s8 + $0x28] sm:$0xff] }
 0x20e   : > { %v3857_v12 = vpop.f32.mrb[8].mxu1 }
 0x20f   : > { %v3858_v9 = vpop.f32.mrb[9].mxu1 }
 0x210   : > { %v3859_v11 = vadd.f32 %v3858_v9, %v3857_v12  ;;  %v2008_v12 = vld [vmem:[%s5747_s9 + $0x90] sm:$0xff]  ;;  %v2009_v9 = vld [vmem:[%s5747_s9 + $0x98] sm:$0xff] }
 0x212   : > { %v3860_v25 = vpop.f32.mrb[10].mxu1 }
 0x213   : > { %v3861_v63 = vpop.f32.mrb[11].mxu1 }
 0x214   : > { %v3862_v36 = vadd.f32 %v3861_v63, %v3860_v25  ;;  %v2011_v25 = vld [vmem:[%s5747_s9 + $0xa8] sm:$0xff]  ;;  %v2012_v63 = vld [vmem:[%s5747_s9 + $0xb0] sm:$0xff] }
 0x23e   : > { %v3895_v47 = vpop.f32.mrb[12].mxu1 }
 0x23f   : > { %v3896_v38 = vpop.f32.mrb[13].mxu1 }
 0x240   : > { %v3897_v62 = vadd.f32 %v3896_v38, %v3895_v47  ;;  %v2014_v47 = vld [vmem:[%s5747_s9 + $0xc0] sm:$0xff]  ;;  %v2015_v38 = vld [vmem:[%s5747_s9 + $0xc8] sm:$0xff] }
 0x242   : > { %v1780_v56 = vadd.f32 %v3897_v62, %v3847_v49  ;;  %v3898_v43 = vpop.f32.mrb[14].mxu1  ;;  %v1942_v49 = vld [vmem:[%s5746_s8] sm:$0xff]  ;;  %v2016_v62 = vld [vmem:[%s5747_s9 + $0xd0] sm:$0xff] }
 0x243   : > { %v3899_v58 = vpop.f32.mrb[15].mxu1  ;;  %4186 = vmatprep.mubr.msk.f32.mxu1 %vm1939_vm2, %v1942_v49 }
 0x244   : > { %v3900_v1 = vadd.f32 %v3899_v58, %v3898_v43  ;;  %v2018_v43 = vld [vmem:[%s5747_s9 + $0xe0] sm:$0xff]  ;;  %v2019_v58 = vld [vmem:[%s5747_s9 + $0xe8] sm:$0xff] }
 0x246   : > { %v1785_v2 = vadd.f32 %v3900_v1, %v3850_v51  ;;  %v3901_v7 = vpop.f32.mrb[16].mxu1  ;;  %v2022_v1 = vld [vmem:[%s5747_s9 + $0x100] sm:$0xff] }
 0x247   : > { %v3902_v10 = vpop.f32.mrb[17].mxu1 }
 0x248   : > { %v3903_v13 = vadd.f32 %v3902_v10, %v3901_v7  ;;  %v2021_v7 = vld [vmem:[%s5747_s9 + $0xf8] sm:$0xff]  ;;  %v2023_v10 = vld [vmem:[%s5747_s9 + $0x108] sm:$0xff] }
 0x24a   : > { %v1790_v14 = vadd.f32 %v3903_v13, %v3853_v60  ;;  %v3904_v15 = vpop.f32.mrb[18].mxu1  ;;  %v2024_v13 = vld [vmem:[%s5747_s9 + $0x110] sm:$0xff] }
 0x24b   : > { %v3905_v17 = vpop.f32.mrb[19].mxu1 }
 0x24c   : > { %v3906_v19 = vadd.f32 %v3905_v17, %v3904_v15  ;;  %v2026_v15 = vld [vmem:[%s5747_s9 + $0x120] sm:$0xff]  ;;  %v2027_v17 = vld [vmem:[%s5747_s9 + $0x128] sm:$0xff] }
 0x24e   : > { %v1795_v20 = vadd.f32 %v3906_v19, %v3856_v8  ;;  %v3907_v21 = vpop.f32.mrb[20].mxu1  ;;  %v2006_v8 = vld [vmem:[%s5747_s9 + $0x80] sm:$0xff]  ;;  %v2028_v19 = vld [vmem:[%s5747_s9 + $0x130] sm:$0xff] }
 0x24f   : > { %v3908_v22 = vpop.f32.mrb[21].mxu1 }
 0x250   : > { %v3909_v24 = vadd.f32 %v3908_v22, %v3907_v21  ;;  %v2030_v21 = vld [vmem:[%s5747_s9 + $0x140] sm:$0xff]  ;;  %v2031_v22 = vld [vmem:[%s5747_s9 + $0x148] sm:$0xff] }
 0x252   : > { %v1800_v26 = vadd.f32 %v3909_v24, %v3859_v11  ;;  %v3910_v29 = vpop.f32.mrb[22].mxu1  ;;  %v2010_v11 = vld [vmem:[%s5747_s9 + $0xa0] sm:$0xff]  ;;  %v2032_v24 = vld [vmem:[%s5747_s9 + $0x150] sm:$0xff] }
 0x253   : > { %v3911_v30 = vpop.f32.mrb[23].mxu1 }
 0x254   : > { %v3912_v31 = vadd.f32 %v3911_v30, %v3910_v29  ;;  %v2034_v29 = vld [vmem:[%s5747_s9 + $0x160] sm:$0xff]  ;;  %v2035_v30 = vld [vmem:[%s5747_s9 + $0x168] sm:$0xff] }
 0x256   : > { %v1805_v32 = vadd.f32 %v3912_v31, %v3862_v36  ;;  %v2013_v36 = vld [vmem:[%s5747_s9 + $0xb8] sm:$0xff]  ;;  %v2036_v31 = vld [vmem:[%s5747_s9 + $0x170] sm:$0xff] }
 0x27e   : > { %v3945_v33 = vpop.f32.mrb[24].mxu1 }
 0x27f   : > { %v3946_v34 = vpop.f32.mrb[25].mxu1 }
 0x280   : > { %v3947_v37 = vadd.f32 %v3946_v34, %v3945_v33  ;;  %v1990_v33 = vld [vmem:[%s5747_s9] sm:$0xff]  ;;  %v1991_v34 = vld [vmem:[%s5747_s9 + $0x8] sm:$0xff] }
 0x282   : > { %v5189_v39 = vadd.f32 %v3947_v37, %v1780_v56  ;;  %v3948_v40 = vpop.f32.mrb[26].mxu1  ;;  %v2017_v56 = vld [vmem:[%s5747_s9 + $0xd8] sm:$0xff]  ;;  %v1992_v37 = vld [vmem:[%s5747_s9 + $0x10] sm:$0xff] }
 0x283   : > { %v3949_v44 = vpop.f32.mrb[27].mxu1 }
 0x284   : > { %v3950_v46 = vadd.f32 %v3949_v44, %v3948_v40  ;;  %v1993_v40 = vld [vmem:[%s5747_s9 + $0x18] sm:$0xff]  ;;  %v1994_v44 = vld [vmem:[%s5747_s9 + $0x20] sm:$0xff] }
 0x286   : > { %v5191_v55 = vadd.f32 %v3950_v46, %v1785_v2  ;;  %v3951_v57 = vpop.f32.mrb[28].mxu1  ;;  %v2020_v2 = vld [vmem:[%s5747_s9 + $0xf0] sm:$0xff]  ;;  %v1995_v46 = vld [vmem:[%s5747_s9 + $0x28] sm:$0xff] }
 0x287   : > { %v3952_v61 = vpop.f32.mrb[29].mxu1 }
 0x288   : > { %v3953_v4 = vadd.f32 %v3952_v61, %v3951_v57  ;;  %v1906_v41 = vrot.slane %v5191_v55, 4  ;;  %v1997_v57 = vld [vmem:[%s5747_s9 + $0x38] sm:$0xff]  ;;  %v1996_v61 = vld [vmem:[%s5747_s9 + $0x30] sm:$0xff] }
 0x28a   : > { %v3954_v35 = vpop.f32.mrb[30].mxu1  ;;  %v1885_v50 = vadd.f32 %v3953_v4, %v1790_v14  ;;  %v2025_v14 = vld [vmem:[%s5747_s9 + $0x118] sm:$0xff]  ;;  %v1998_v4 = vld [vmem:[%s5747_s9 + $0x40] sm:$0xff] }
 0x28b   : > { %v3955_v5 = vpop.f32.mrb[31].mxu1 }
 0x28c   : > { %v3956_v6 = vadd.f32 %v3955_v5, %v3954_v35  ;;  %v1907_v42 = vrot.slane %v1885_v50, 4  ;;  %v1999_v35 = vld [vmem:[%s5747_s9 + $0x48] sm:$0xff]  ;;  %v2001_v50 = vld [vmem:[%s5747_s9 + $0x58] sm:$0xff]  ;;  %v2000_v5 = vld [vmem:[%s5747_s9 + $0x50] sm:$0xff] }
 0x28e   : > { %v3957_v16 = vpop.f32.mrb[32].mxu1  ;;  %1911 = vrot.lane.b32.xlu0 %v1907_v42, %s4525_s25  ;;  %v1890_v52 = vadd.f32 %v3956_v6, %v1795_v20  ;;  %v1908_v48 = vsel %vm1905_vm1, %v1906_v41, %v1907_v42  ;;  %v2029_v20 = vld [vmem:[%s5747_s9 + $0x138] sm:$0xff]  ;;  %v2003_v6 = vld [vmem:[%s5747_s9 + $0x68] sm:$0xff]  ;;  %v2002_v42 = vld [vmem:[%s5747_s9 + $0x60] sm:$0xff] }
 0x28f   : > { %v3958_v45 = vpop.f32.mrb[33].mxu1 }
 0x290   : > { %v3959_v18 = vadd.f32 %v3958_v45, %v3957_v16  ;;  %1917 = vrot.lane.b32.xlu1 %v1890_v52, %s4526_s26 }
 0x292   : > { %v1895_v53 = vadd.f32 %v3959_v18, %v1800_v26  ;;  %v3960_v3 = vpop.f32.mrb[34].mxu1  ;;  %1909 = vrot.lane.b32.xlu0 %v1908_v48, %s4525_s25  ;;  %v2033_v26 = vld [vmem:[%s5747_s9 + $0x158] sm:$0xff]  ;;  %s4531_s25 = smov 112  }
 0x293   : > { %v3961_v54 = vpop.f32.mrb[35].mxu1 }
 0x294   : > { %v3962_v23 = vadd.f32 %v3961_v54, %v3960_v3  ;;  %1919 = vrot.lane.b32.xlu1 %v1895_v53, %s4526_s26  ;;  %v1924_v59 = vrot.slane %v1895_v53, 4  ;;  %s3715_s26 = sshll.u32 %s5763_s30, 7 }
 0x296   : > { %v1900_v51 = vadd.f32 %v3962_v23, %v1805_v32  ;;  %v2037_v32 = vld [vmem:[%s5747_s9 + $0x178] sm:$0xff] }
 0x298   : > { %v1925_v27 = vrot.slane %v1900_v51, 4 }
 0x29a   : > { %1929 = vrot.lane.b32.xlu1 %v1925_v27, %s4527_s15  ;;  %v1926_v60 = vsel %vm1905_vm1, %v1924_v59, %v1925_v27  ;;  %v1945_v27 = vld [vmem:[%s5746_s8 + $0x18] sm:$0xff] }
 0x29b   : > { %1927 = vrot.lane.b32.xlu0 %v1926_v60, %s4527_s15  ;;  %v1946_v60 = vld [vmem:[%s5746_s8 + $0x20] sm:$0xff]  ;;  %s5717_s15 = scalar_lea.vmem %s5752_s14, %s3715_s26 }
 0x29e   : > { %2125 = vperm.xlu1 %4459, %v2007_v28   ;;  %v1948_v28 = vld [vmem:[%s5746_s8 + $0x30] sm:$0xff] }
 0x29f   : > { %2120 = vperm.xlu0 %4458, %v2006_v8   ;;  %v1949_v8 = vld [vmem:[%s5746_s8 + $0x38] sm:$0xff] }
 0x2a2   : > { %2130 = vperm.xlu1 %4459, %v2008_v12   ;;  %v1950_v12 = vld [vmem:[%s5746_s8 + $0x40] sm:$0xff] }
 0x2a3   : > { %2135 = vperm.xlu0 %4458, %v2009_v9   ;;  %v1951_v9 = vld [vmem:[%s5746_s8 + $0x48] sm:$0xff] }
 0x2a6   : > { %2140 = vperm.xlu1 %4459, %v2010_v11   ;;  %v1952_v11 = vld [vmem:[%s5746_s8 + $0x50] sm:$0xff] }
 0x2a7   : > { %2145 = vperm.xlu0 %4458, %v2011_v25   ;;  %v1953_v25 = vld [vmem:[%s5746_s8 + $0x58] sm:$0xff] }
 0x2aa   : > { %2150 = vperm.xlu1 %4459, %v2012_v63   ;;  %v1954_v63 = vld [vmem:[%s5746_s8 + $0x60] sm:$0xff] }
 0x2ab   : > { %2155 = vperm.xlu0 %4458, %v2013_v36   ;;  %v1955_v36 = vld [vmem:[%s5746_s8 + $0x68] sm:$0xff] }
 0x2ae   : > { %2160 = vperm.xlu1 %4459, %v2014_v47   ;;  %v1956_v47 = vld [vmem:[%s5746_s8 + $0x70] sm:$0xff] }
 0x2af   : > { %2165 = vperm.xlu0 %4458, %v2015_v38   ;;  %v1957_v38 = vld [vmem:[%s5746_s8 + $0x78] sm:$0xff] }
 0x2b2   : > { %2170 = vperm.xlu1 %4459, %v2016_v62   ;;  %v1958_v62 = vld [vmem:[%s5746_s8 + $0x80] sm:$0xff] }
 0x2b3   : > { %2175 = vperm.xlu0 %4458, %v2017_v56   ;;  %v1959_v56 = vld [vmem:[%s5746_s8 + $0x88] sm:$0xff] }
 0x2b6   : > { %2180 = vperm.xlu1 %4459, %v2018_v43   ;;  %v1960_v43 = vld [vmem:[%s5746_s8 + $0x90] sm:$0xff] }
 0x2b7   : > { %2185 = vperm.xlu0 %4458, %v2019_v58   ;;  %v1961_v58 = vld [vmem:[%s5746_s8 + $0x98] sm:$0xff] }
 0x2ba   : > { %2200 = vperm.xlu1 %4459, %v2022_v1   ;;  %v1962_v1 = vld [vmem:[%s5746_s8 + $0xa0] sm:$0xff] }
 0x2bb   : > { %2190 = vperm.xlu0 %4458, %v2020_v2   ;;  %v1963_v2 = vld [vmem:[%s5746_s8 + $0xa8] sm:$0xff] }
 0x2be   : > { %2195 = vperm.xlu1 %4459, %v2021_v7   ;;  %v1964_v7 = vld [vmem:[%s5746_s8 + $0xb0] sm:$0xff] }
 0x2bf   : > { %2205 = vperm.xlu0 %4458, %v2023_v10   ;;  %v1965_v10 = vld [vmem:[%s5746_s8 + $0xb8] sm:$0xff] }
 0x2c2   : > { %2210 = vperm.xlu1 %4459, %v2024_v13   ;;  %v1966_v13 = vld [vmem:[%s5746_s8 + $0xc0] sm:$0xff] }
 0x2c3   : > { %2215 = vperm.xlu0 %4458, %v2025_v14   ;;  %v1967_v14 = vld [vmem:[%s5746_s8 + $0xc8] sm:$0xff] }
 0x2c6   : > { %2220 = vperm.xlu1 %4459, %v2026_v15   ;;  %v1968_v15 = vld [vmem:[%s5746_s8 + $0xd0] sm:$0xff] }
 0x2c7   : > { %2225 = vperm.xlu0 %4458, %v2027_v17   ;;  %v1969_v17 = vld [vmem:[%s5746_s8 + $0xd8] sm:$0xff] }
 0x2ca   : > { %2230 = vperm.xlu1 %4459, %v2028_v19   ;;  %v1970_v19 = vld [vmem:[%s5746_s8 + $0xe0] sm:$0xff] }
 0x2cb   : > { %2235 = vperm.xlu0 %4458, %v2029_v20   ;;  %v1971_v20 = vld [vmem:[%s5746_s8 + $0xe8] sm:$0xff] }
 0x2ce   : > { %2240 = vperm.xlu1 %4459, %v2030_v21   ;;  %v1972_v21 = vld [vmem:[%s5746_s8 + $0xf0] sm:$0xff] }
 0x2cf   : > { %2245 = vperm.xlu0 %4458, %v2031_v22   ;;  %v1973_v22 = vld [vmem:[%s5746_s8 + $0xf8] sm:$0xff] }
 0x2d2   : > { %2250 = vperm.xlu1 %4459, %v2032_v24   ;;  %v1974_v24 = vld [vmem:[%s5746_s8 + $0x100] sm:$0xff] }
 0x2d3   : > { %2255 = vperm.xlu0 %4458, %v2033_v26   ;;  %v1975_v26 = vld [vmem:[%s5746_s8 + $0x108] sm:$0xff] }
 0x2d6   : > { %2260 = vperm.xlu1 %4459, %v2034_v29   ;;  %v1976_v29 = vld [vmem:[%s5746_s8 + $0x110] sm:$0xff] }
 0x2d7   : > { %2265 = vperm.xlu0 %4458, %v2035_v30   ;;  %v1977_v30 = vld [vmem:[%s5746_s8 + $0x118] sm:$0xff] }
 0x2da   : > { %2270 = vperm.xlu1 %4459, %v2036_v31   ;;  %v1978_v31 = vld [vmem:[%s5746_s8 + $0x120] sm:$0xff] }
 0x2db   : > { %2275 = vperm.xlu0 %4458, %v2037_v32   ;;  %v1979_v32 = vld [vmem:[%s5746_s8 + $0x128] sm:$0xff] }
 0x2de   : > { %2040 = vperm.xlu1 %4459, %v1990_v33   ;;  %v1980_v33 = vld [vmem:[%s5746_s8 + $0x130] sm:$0xff] }
 0x2df   : > { %2045 = vperm.xlu0 %4458, %v1991_v34   ;;  %v1981_v34 = vld [vmem:[%s5746_s8 + $0x138] sm:$0xff] }
 0x2e2   : > { %2050 = vperm.xlu1 %4459, %v1992_v37   ;;  %v1982_v37 = vld [vmem:[%s5746_s8 + $0x140] sm:$0xff] }
 0x2e3   : > { %2055 = vperm.xlu0 %4458, %v1993_v40   ;;  %v1983_v40 = vld [vmem:[%s5746_s8 + $0x148] sm:$0xff] }
 0x2e6   : > { %2060 = vperm.xlu1 %4459, %v1994_v44   ;;  %v1984_v44 = vld [vmem:[%s5746_s8 + $0x150] sm:$0xff] }
 0x2e7   : > { %2065 = vperm.xlu0 %4458, %v1995_v46   ;;  %v1985_v46 = vld [vmem:[%s5746_s8 + $0x158] sm:$0xff] }
 0x2ea   : > { %2075 = vperm.xlu1 %4459, %v1997_v57   ;;  %v1986_v57 = vld [vmem:[%s5746_s8 + $0x160] sm:$0xff] }
 0x2eb   : > { %2070 = vperm.xlu0 %4458, %v1996_v61   ;;  %v1987_v61 = vld [vmem:[%s5746_s8 + $0x168] sm:$0xff] }
 0x2ee   : > { %2080 = vperm.xlu1 %4459, %v1998_v4   ;;  %v1988_v4 = vld [vmem:[%s5746_s8 + $0x170] sm:$0xff] }
 0x2ef   : > { %2085 = vperm.xlu0 %4458, %v1999_v35   ;;  %v1989_v35 = vld [vmem:[%s5746_s8 + $0x178] sm:$0xff] }
 0x2f2   : > { %2095 = vperm.xlu1 %4459, %v2001_v50  }
 0x2f3   : > { %2090 = vperm.xlu0 %4458, %v2000_v5  }
 0x2f6   : > { %2100 = vperm.xlu1 %4459, %v2002_v42  }
 0x2f7   : > { %2105 = vperm.xlu0 %4458, %v2003_v6  }
 0x300   : > { %v1912_v16 = vpop.permute.xlu0 %1911 }
 0x301   : > { %v1935_v48 = vsel %vm1933_vm3, %v5191_v55, %v1912_v16  ;;  %v1944_v55 = vld [vmem:[%s5746_s8 + $0x10] sm:$0xff] }
 0x302   : > { %v1918_v52 = vpop.permute.xlu1 %1917 }
 0x304   : > { %v1910_v41 = vpop.permute.xlu0 %1909 }
 0x305   : > { %v1934_v18 = vsel %vm1933_vm3, %v5189_v39, %v1910_v41  ;;  %v1943_v39 = vld [vmem:[%s5746_s8 + $0x8] sm:$0xff] }
 0x306   : > { %v1920_v45 = vpop.permute.xlu1 %1919  ;;  %v1937_v23 = vsel %vm1936_vm4, %v1934_v18, %v1918_v52 }
 0x307   : > { %v1938_v53 = vsel %vm1936_vm4, %v1935_v48, %v1920_v45 }
 0x30c   : > { %v1930_v3 = vpop.permute.xlu1 %1929 }
 0x30d   : > { %v5343_v49 = vsel %vm1939_vm2, %v1938_v53, %v1930_v3  ;;  %v1928_v54 = vpop.permute.xlu0 %1927 }
 0x30e   : > { %v1940_v51 = vsel %vm1939_vm2, %v1937_v23, %v1928_v54 }
 0x30f   : > { %v4397_v59 = vpack.c.bf16 %v5343_v49, %v1940_v51 }
 0x311   : > { %4399 = vmatprep.subr.msk.bf16.mxu1 %vm4398_vm6, %v4397_v59 }
 0x312   : > { %4402 = vmatpush3.bf16.msk.msra.mxu1 %vm4398_vm6, %v4397_v59 }
 0x315   : > { %4187 = vmatmul.mubr.msk.f32.vlgmr.msra.gmra.mrb[36].mxu1 %vm1939_vm2, %v1943_v39 }
 0x316   : > { %4189 = vmatprep.mubr.msk.f32.mxu1 %vm1939_vm2, %v1944_v55 }
 0x319   : > { %4190 = vmatmul.mubr.msk.f32.gmra.mrb[38].mxu1 %vm1939_vm2, %v1945_v27 }
 0x31a   : > { %4192 = vmatprep.mubr.msk.f32.mxu1 %vm1939_vm2, %v1946_v60 }
 0x31d   : > { %4193 = vmatmul.mubr.msk.f32.gmra.mrb[40].mxu1 %vm1939_vm2, %v1947_v0  ;;  %v2126_v41 = vpop.permute.xlu1 %2125 }
 0x31e   : > { %4195 = vmatprep.mubr.msk.f32.mxu1 %vm1939_vm2, %v1948_v28  ;;  %v2121_v54 = vpop.permute.xlu0 %2120 }
 0x321   : > { %4196 = vmatmul.mubr.msk.f32.gmra.mrb[42].mxu1 %vm1939_vm2, %v1949_v8  ;;  %v2131_v3 = vpop.permute.xlu1 %2130 }
 0x322   : > { %4198 = vmatprep.mubr.msk.f32.mxu1 %vm1939_vm2, %v1950_v12  ;;  %v2136_v55 = vpop.permute.xlu0 %2135 }
 0x325   : > { %4199 = vmatmul.mubr.msk.f32.gmra.mrb[44].mxu1 %vm1939_vm2, %v1951_v9  ;;  %v2141_v59 = vpop.permute.xlu1 %2140 }
 0x326   : > { %4201 = vmatprep.mubr.msk.f32.mxu1 %vm1939_vm2, %v1952_v11  ;;  %v2146_v8 = vpop.permute.xlu0 %2145 }
 0x329   : > { %4202 = vmatmul.mubr.msk.f32.gmra.mrb[46].mxu1 %vm1939_vm2, %v1953_v25  ;;  %v2151_v28 = vpop.permute.xlu1 %2150 }
 0x32a   : > { %4204 = vmatprep.mubr.msk.f32.mxu1 %vm1939_vm2, %v1954_v63 }
 0x32d   : > { %4205 = vmatmul.mubr.msk.f32.gmra.mrb[48].mxu1 %vm1939_vm2, %v1955_v36  ;;  %v2161_v63 = vpop.permute.xlu1 %2160 }
 0x32e   : > { %4207 = vmatprep.mubr.msk.f32.mxu1 %vm1939_vm2, %v1956_v47 }
 0x331   : > { %4208 = vmatmul.mubr.msk.f32.gmra.mrb[50].mxu1 %vm1939_vm2, %v1957_v38  ;;  %v2156_v38 = vpop.permute.xlu0 %2155 }
 0x332   : > { %4210 = vmatprep.mubr.msk.f32.mxu1 %vm1939_vm2, %v1958_v62 }
 0x335   : > { %4211 = vmatmul.mubr.msk.f32.gmra.mrb[52].mxu1 %vm1939_vm2, %v1959_v56 }
 0x336   : > { %4213 = vmatprep.mubr.msk.f32.mxu1 %vm1939_vm2, %v1960_v43 }
 0x339   : > { %4214 = vmatmul.mubr.msk.f32.gmra.mrb[54].mxu1 %vm1939_vm2, %v1961_v58 }
 0x33a   : > { %4216 = vmatprep.mubr.msk.f32.mxu1 %vm1939_vm2, %v1962_v1 }
 0x33d   : > { %4217 = vmatmul.mubr.msk.f32.gmra.mrb[56].mxu1 %vm1939_vm2, %v1963_v2 }
 0x33e   : > { %4219 = vmatprep.mubr.msk.f32.mxu1 %vm1939_vm2, %v1964_v7 }
 0x341   : > { %4220 = vmatmul.mubr.msk.f32.gmra.mrb[58].mxu1 %vm1939_vm2, %v1965_v10  ;;  %v2171_v10 = vpop.permute.xlu1 %2170 }
 0x342   : > { %4222 = vmatprep.mubr.msk.f32.mxu1 %vm1939_vm2, %v1966_v13 }
 0x345   : > { %4223 = vmatmul.mubr.msk.f32.gmra.mrb[60].mxu1 %vm1939_vm2, %v1967_v14  ;;  %v2166_v14 = vpop.permute.xlu0 %2165 }
 0x346   : > { %4225 = vmatprep.mubr.msk.f32.mxu1 %vm1939_vm2, %v1968_v15 }
 0x349   : > { %4226 = vmatmul.mubr.msk.f32.gmra.mrb[62].mxu1 %vm1939_vm2, %v1969_v17 }
 0x34a   : > { %4228 = vmatprep.mubr.msk.f32.mxu1 %vm1939_vm2, %v1970_v19 }
 0x34d   : > { %4229 = vmatmul.mubr.msk.f32.gmra.mrb[64].mxu1 %vm1939_vm2, %v1971_v20 }
 0x34e   : > { %4231 = vmatprep.mubr.msk.f32.mxu1 %vm1939_vm2, %v1972_v21 }
 0x351   : > { %4232 = vmatmul.mubr.msk.f32.gmra.mrb[66].mxu1 %vm1939_vm2, %v1973_v22  ;;  %v2005_v22 = vld [vmem:[%s5747_s9 + $0x78] sm:$0xff] }
 0x352   : > { %4234 = vmatprep.mubr.msk.f32.mxu1 %vm1939_vm2, %v1974_v24  ;;  %v2181_v24 = vpop.permute.xlu1 %2180 }
 0x355   : > { %4235 = vmatmul.mubr.msk.f32.gmra.mrb[68].mxu1 %vm1939_vm2, %v1975_v26 }
 0x356   : > { %4237 = vmatprep.mubr.msk.f32.mxu1 %vm1939_vm2, %v1976_v29 }
 0x359   : > { %4238 = vmatmul.mubr.msk.f32.gmra.mrb[70].mxu1 %vm1939_vm2, %v1977_v30  ;;  %v2176_v30 = vpop.permute.xlu0 %2175 }
 0x35a   : > { %4240 = vmatprep.mubr.msk.f32.mxu1 %vm1939_vm2, %v1978_v31 }
 0x35d   : > { %4241 = vmatmul.mubr.msk.f32.gmra.mrb[72].mxu1 %vm1939_vm2, %v1979_v32 }
 0x35e   : > { %4243 = vmatprep.mubr.msk.f32.mxu1 %vm1939_vm2, %v1980_v33 }
 0x361   : > { %4244 = vmatmul.mubr.msk.f32.gmra.mrb[74].mxu1 %vm1939_vm2, %v1981_v34  ;;  %v2004_v34 = vld [vmem:[%s5747_s9 + $0x70] sm:$0xff] }
 0x362   : > { %4246 = vmatprep.mubr.msk.f32.mxu1 %vm1939_vm2, %v1982_v37 }
 0x365   : > { %4247 = vmatmul.mubr.msk.f32.gmra.mrb[76].mxu1 %vm1939_vm2, %v1983_v40 }
 0x366   : > { %4249 = vmatprep.mubr.msk.f32.mxu1 %vm1939_vm2, %v1984_v44 }
 0x369   : > { %4250 = vmatmul.mubr.msk.f32.gmra.mrb[78].mxu1 %vm1939_vm2, %v1985_v46 }
 0x36a   : > { %4252 = vmatprep.mubr.msk.f32.mxu1 %vm1939_vm2, %v1986_v57  ;;  %v2201_v57 = vpop.permute.xlu1 %2200 }
 0x36d   : > { %4253 = vmatmul.mubr.msk.f32.gmra.mrb[80].mxu1 %vm1939_vm2, %v1987_v61 }
 0x36e   : > { %4255 = vmatprep.mubr.msk.f32.mxu1 %vm1939_vm2, %v1988_v4  ;;  %v2186_v4 = vpop.permute.xlu0 %2185 }
 0x371   : > { %4256 = vmatmul.mubr.msk.f32.gmra.mrb[82].mxu1 %vm1939_vm2, %v1989_v35 }
 0x3e8   : > { %v5536_v50 = vpop.f32.mrb[36].mxu1 }
 0x3e9   : > { %v5538_v5 = vpop.f32.mrb[37].mxu1 }
 0x3ec   : > { %v5540_v6 = vpop.f32.mrb[38].mxu1 }
 0x3ed   : > { %v5542_v42 = vpop.f32.mrb[39].mxu1 }
 0x3f0   : > { %v5544_v16 = vpop.f32.mrb[40].mxu1 }
 0x3f1   : > { %v5546_v52 = vpop.f32.mrb[41].mxu1 }
 0x3f4   : > { %v5548_v45 = vpop.f32.mrb[42].mxu1 }
 0x3f5   : > { %v5550_v18 = vpop.f32.mrb[43].mxu1 }
 0x3f8   : > { %v5552_v48 = vpop.f32.mrb[44].mxu1 }
 0x3f9   : > { %v5554_v53 = vpop.f32.mrb[45].mxu1 }
 0x3fc   : > { %v5556_v23 = vpop.f32.mrb[46].mxu1 }
 0x3fd   : > { %v5558_v51 = vpop.f32.mrb[47].mxu1 }
 0x400   : > { %v5560_v39 = vpop.f32.mrb[48].mxu1 }
 0x401   : > { %v5562_v27 = vpop.f32.mrb[49].mxu1 }
 0x404   : > { %v5564_v60 = vpop.f32.mrb[50].mxu1 }
 0x405   : > { %v5566_v0 = vpop.f32.mrb[51].mxu1 }
 0x408   : > { %v4212_v12 = vpop.f32.mrb[52].mxu1 }
 0x409   : > { %v2577_v9 = vadd.f32 %v4212_v12, %v2126_v41  ;;  %v2571_v11 = vpop.f32.mrb[53].mxu1  ;;  %v2191_v12 = vpop.permute.xlu0 %2190 }
 0x40a   : > { %v2572_v25 = vadd.f32 %v2571_v11, %v2121_v54 }
 0x40c   : > { %v4460_v36 = vpack.i.bf16 %v2577_v9, %v2572_v25  ;;  %v4215_v47 = vpop.f32.mrb[54].mxu1 }
 0x40d   : > { %v2587_v62 = vadd.f32 %v4215_v47, %v2136_v55  ;;  %v2581_v56 = vpop.f32.mrb[55].mxu1  ;;  %v2196_v55 = vpop.permute.xlu1 %2195 }
 0x40e   : > { %v2582_v43 = vadd.f32 %v2581_v56, %v2131_v3  ;;  %4461 = vrot.lane.b32.xlu1 %v4460_v36, %s4530_s18 }
 0x410   : > { %v4465_v58 = vpack.i.bf16 %v2587_v62, %v2582_v43  ;;  %v4218_v1 = vpop.f32.mrb[56].mxu1 }
 0x411   : > { %v2597_v2 = vadd.f32 %v4218_v1, %v2146_v8  ;;  %v2591_v7 = vpop.f32.mrb[57].mxu1  ;;  %v2211_v43 = vpop.permute.xlu1 %2210 }
 0x412   : > { %v2592_v13 = vadd.f32 %v2591_v7, %v2141_v59  ;;  %4466 = vrot.lane.b32.xlu0 %v4465_v58, %s4530_s18 }
 0x414   : > { %v4470_v15 = vpack.i.bf16 %v2597_v2, %v2592_v13  ;;  %v4221_v17 = vpop.f32.mrb[58].mxu1 }
 0x415   : > { %v2607_v19 = vadd.f32 %v4221_v17, %v2156_v38  ;;  %v2601_v20 = vpop.f32.mrb[59].mxu1  ;;  %v2206_v38 = vpop.permute.xlu0 %2205 }
 0x416   : > { %v2602_v21 = vadd.f32 %v2601_v20, %v2151_v28  ;;  %4471 = vrot.lane.b32.xlu1 %v4470_v15, %s4530_s18  ;;  %v2221_v7 = vpop.permute.xlu1 %2220 }
 0x418   : > { %v4475_v26 = vpack.i.bf16 %v2607_v19, %v2602_v21  ;;  %v4224_v29 = vpop.f32.mrb[60].mxu1 }
 0x419   : > { %v2617_v31 = vadd.f32 %v4224_v29, %v2166_v14  ;;  %v2611_v32 = vpop.f32.mrb[61].mxu1  ;;  %v2216_v2 = vpop.permute.xlu0 %2215 }
 0x41a   : > { %v2612_v33 = vadd.f32 %v2611_v32, %v2161_v63  ;;  %4476 = vrot.lane.b32.xlu0 %v4475_v26, %s4530_s18  ;;  %2115 = vperm.xlu1 %4459, %v2005_v22   ;;  %v2231_v19 = vpop.permute.xlu1 %2230 }
 0x41c   : > { %v4480_v37 = vpack.i.bf16 %v2617_v31, %v2612_v33  ;;  %v4227_v40 = vpop.f32.mrb[62].mxu1 }
 0x41d   : > { %v2627_v44 = vadd.f32 %v4227_v40, %v2176_v30  ;;  %v2621_v46 = vpop.f32.mrb[63].mxu1  ;;  %v2226_v14 = vpop.permute.xlu0 %2225 }
 0x41e   : > { %v2622_v61 = vadd.f32 %v2621_v46, %v2171_v10  ;;  %2110 = vperm.xlu0 %4458, %v2004_v34   ;;  %4481 = vrot.lane.b32.xlu1 %v4480_v37, %s4530_s18 }
 0x420   : > { %v4485_v35 = vpack.i.bf16 %v2627_v44, %v2622_v61  ;;  %v4230_v41 = vpop.f32.mrb[64].mxu1 }
 0x421   : > { %v2637_v3 = vadd.f32 %v4230_v41, %v2186_v4  ;;  %v2631_v54 = vpop.f32.mrb[65].mxu1  ;;  %v2236_v22 = vpop.permute.xlu0 %2235 }
 0x422   : > { %v2632_v59 = vadd.f32 %v2631_v54, %v2181_v24  ;;  %4486 = vrot.lane.b32.xlu0 %v4485_v35, %s4530_s18  ;;  %v2241_v24 = vpop.permute.xlu1 %2240 }
 0x424   : > { %v4490_v28 = vpack.i.bf16 %v2637_v3, %v2632_v59  ;;  %v4233_v8 = vpop.f32.mrb[66].mxu1 }
 0x425   : > { %v2647_v9 = vadd.f32 %v4233_v8, %v2196_v55  ;;  %v2641_v11 = vpop.f32.mrb[67].mxu1  ;;  %v2246_v30 = vpop.permute.xlu0 %2245 }
 0x426   : > { %v2642_v25 = vadd.f32 %v2641_v11, %v2191_v12  ;;  %4491 = vrot.lane.b32.xlu1 %v4490_v28, %s4530_s18  ;;  %v2251_v33 = vpop.permute.xlu1 %2250 }
 0x428   : > { %v4495_v63 = vpack.i.bf16 %v2647_v9, %v2642_v25  ;;  %v4236_v36 = vpop.f32.mrb[68].mxu1 }
 0x429   : > { %v2651_v47 = vpop.f32.mrb[69].mxu1  ;;  %v2256_v34 = vpop.permute.xlu0 %2255  ;;  %v2657_v46 = vadd.f32 %v4236_v36, %v2206_v38 }
 0x42a   : > { %4496 = vrot.lane.b32.xlu0 %v4495_v63, %s4530_s18  ;;  %v2261_v37 = vpop.permute.xlu1 %2260  ;;  %v2652_v40 = vadd.f32 %v2651_v47, %v2201_v57 }
 0x42c   : > { %v4239_v62 = vpop.f32.mrb[70].mxu1 }
 0x42d   : > { %v2661_v56 = vpop.f32.mrb[71].mxu1  ;;  %v2266_v44 = vpop.permute.xlu0 %2265  ;;  %v2667_v3 = vadd.f32 %v4239_v62, %v2216_v2 }
 0x42e   : > { %v2271_v61 = vpop.permute.xlu1 %2270  ;;  %v2662_v4 = vadd.f32 %v2661_v56, %v2211_v43 }
 0x430   : > { %v4242_v58 = vpop.f32.mrb[72].mxu1 }
 0x431   : > { %v2671_v1 = vpop.f32.mrb[73].mxu1  ;;  %v2276_v35 = vpop.permute.xlu0 %2275  ;;  %v2677_v28 = vadd.f32 %v4242_v58, %v2226_v14 }
 0x432   : > { %v2041_v41 = vpop.permute.xlu1 %2040  ;;  %v2672_v59 = vadd.f32 %v2671_v1, %v2221_v7 }
 0x434   : > { %v4245_v10 = vpop.f32.mrb[74].mxu1 }
 0x435   : > { %v2681_v13 = vpop.f32.mrb[75].mxu1  ;;  %v2046_v54 = vpop.permute.xlu0 %2045  ;;  %v2687_v11 = vadd.f32 %v4245_v10, %v2236_v22 }
 0x436   : > { %v2051_v55 = vpop.permute.xlu1 %2050  ;;  %v2682_v57 = vadd.f32 %v2681_v13, %v2231_v19  ;;  %v2497_v10 = vadd.f32 %v5536_v50, %v2046_v54 }
 0x438   : > { %v4248_v15 = vpop.f32.mrb[76].mxu1 }
 0x439   : > { %v2691_v17 = vpop.f32.mrb[77].mxu1  ;;  %v2056_v8 = vpop.permute.xlu0 %2055  ;;  %v2697_v38 = vadd.f32 %v4248_v15, %v2246_v30  ;;  %v2492_v15 = vadd.f32 %v5538_v5, %v2041_v41 }
 0x43a   : > { %v2061_v12 = vpop.permute.xlu1 %2060  ;;  %v2692_v63 = vadd.f32 %v2691_v17, %v2241_v24  ;;  %v2507_v24 = vadd.f32 %v5540_v6, %v2056_v8 }
 0x43b   : > { %v2512_v6 = vadd.f32 %v5546_v52, %v2061_v12 }
 0x43c   : > { %v4251_v20 = vpop.f32.mrb[78].mxu1 }
 0x43d   : > { %v2701_v21 = vpop.f32.mrb[79].mxu1  ;;  %v2066_v9 = vpop.permute.xlu0 %2065  ;;  %v2707_v58 = vadd.f32 %v4251_v20, %v2256_v34 }
 0x43e   : > { %v2076_v25 = vpop.permute.xlu1 %2075  ;;  %v2702_v56 = vadd.f32 %v2701_v21, %v2251_v33  ;;  %v2502_v33 = vadd.f32 %v5542_v42, %v2051_v55 }
 0x440   : > { %v4254_v26 = vpop.f32.mrb[80].mxu1 }
 0x441   : > { %v2711_v29 = vpop.f32.mrb[81].mxu1  ;;  %v2071_v36 = vpop.permute.xlu0 %2070  ;;  %v2717_v17 = vadd.f32 %v4254_v26, %v2266_v44 }
 0x442   : > { %v5584_v47 = vpop.permute.xlu1 %2080  ;;  %v2712_v7 = vadd.f32 %v2711_v29, %v2261_v37 }
 0x444   : > { %v5582_v31 = vpop.f32.mrb[82].mxu1 }
 0x445   : > { %v2721_v32 = vpop.f32.mrb[83].mxu1  ;;  %v2086_v62 = vpop.permute.xlu0 %2085 }
 0x446   : > { %v5586_v43 = vpop.permute.xlu1 %2095  ;;  %v2722_v50 = vadd.f32 %v2721_v32, %v2271_v61 }
 0x449   : > { %v5588_v1 = vpop.permute.xlu0 %2090 }
 0x44a   : > { %v5590_v2 = vpop.permute.xlu1 %2100 }
 0x44d   : > { %v2106_v13 = vpop.permute.xlu0 %2105 }
 0x44f   : > { %2811 = vxpose.xlu1.b32.start [1/16] (narrow) %v2652_v40, 16  ;;  %v2517_v40 = vadd.f32 %v5544_v16, %v2066_v9  ;;  %v2522_v16 = vadd.f32 %v5550_v18, %v2071_v36  ;;  %v2537_v9 = vadd.f32 %v5552_v48, %v2086_v62  ;;  %v2552_v48 = vadd.f32 %v5562_v27, %v5590_v2 }
 0x453   : > { %2812 = vxpose.xlu1.b32.cont [2/16] (narrow) %v2657_v46, 16 }
 0x457   : > { %2813 = vxpose.xlu1.b32.cont [3/16] (narrow) %v2662_v4, 16  ;;  %v2727_v4 = vadd.f32 %v5582_v31, %v2276_v35 }
 0x45b   : > { %2814 = vxpose.xlu1.b32.cont [4/16] (narrow) %v2667_v3, 16 }
 0x45f   : > { %2815 = vxpose.xlu1.b32.cont [5/16] (narrow) %v2672_v59, 16  ;;  %v2527_v59 = vadd.f32 %v5548_v45, %v2076_v25  ;;  %v2532_v45 = vadd.f32 %v5554_v53, %v5584_v47  ;;  %v2547_v25 = vadd.f32 %v5556_v23, %v5586_v43 }
 0x463   : > { %2816 = vxpose.xlu1.b32.cont [6/16] (narrow) %v2677_v28, 16 }
 0x467   : > { %2817 = vxpose.xlu1.b32.cont [7/16] (narrow) %v2682_v57, 16 }
 0x46b   : > { %2818 = vxpose.xlu1.b32.cont [8/16] (narrow) %v2687_v11, 16 }
 0x46f   : > { %2819 = vxpose.xlu1.b32.cont [9/16] (narrow) %v2692_v63, 16 }
 0x473   : > { %2820 = vxpose.xlu1.b32.cont [10/16] (narrow) %v2697_v38, 16  ;;  %v2542_v38 = vadd.f32 %v5558_v51, %v5588_v1 }
 0x477   : > { %2821 = vxpose.xlu1.b32.cont [11/16] (narrow) %v2702_v56, 16  ;;  %v2557_v56 = vadd.f32 %v5560_v39, %v2106_v13 }
 0x47b   : > { %2822 = vxpose.xlu1.b32.cont [12/16] (narrow) %v2707_v58, 16 }
 0x47f   : > { %2823 = vxpose.xlu1.b32.cont [13/16] (narrow) %v2712_v7, 16 }
 0x480   : > { %v4462_v14 = vpop.permute.xlu1 %4461 }
 0x481   : > { %v4464_v19 = vunpack.i.h.bf16 %v4462_v14  ;;  %v4463_v21 = vunpack.i.l.bf16 %v4462_v14 }
 0x483   : > { %2824 = vxpose.xlu1.b32.cont [14/16] (narrow) %v2717_v17, 16  ;;  %v2795_v20 = vsel %vm2794_vm7, %v2492_v15, %v4463_v21  ;;  %v2796_v22 = vsel %vm2794_vm7, %v2497_v10, %v4464_v19 }
 0x484   : > { %v4467_v30 = vpop.permute.xlu0 %4466  ;;  %v4403_v29 = vpack.c.bf16 %v2796_v22, %v2795_v20 }
 0x485   : > { %v4469_v34 = vunpack.i.h.bf16 %v4467_v30  ;;  %v4468_v37 = vunpack.i.l.bf16 %v4467_v30 }
 0x486   : > { %4404 = vmatprep.subr.bf16.mxu0 %v4403_v29 }
 0x487   : > { %2825 = vxpose.xlu1.b32.cont [15/16] (narrow) %v2722_v50, 16  ;;  %4406 = vmatpush3.bf16.msra.mxu0 %v4403_v29  ;;  %v2797_v5 = vsel %vm2794_vm7, %v2502_v33, %v4468_v37  ;;  %v2798_v26 = vsel %vm2794_vm7, %v2507_v24, %v4469_v34 }
 0x488   : > { %v4472_v44 = vpop.permute.xlu1 %4471  ;;  %v4407_v46 = vpack.c.bf16 %v2798_v26, %v2797_v5 }
 0x489   : > { %v4474_v41 = vunpack.i.h.bf16 %v4472_v44  ;;  %v4473_v42 = vunpack.i.l.bf16 %v4472_v44 }
 0x48a   : > { %4408 = vmatprep.subr.bf16.mxu0 %v4407_v46 }
 0x48b   : > { %2826 = vxpose.xlu1.b32.end [16/16] (narrow) %v2727_v4, 16  ;;  %4410 = vmatpush3.bf16.msra.mxu0 %v4407_v46  ;;  %v2799_v32 = vsel %vm2794_vm7, %v2512_v6, %v4473_v42  ;;  %v2800_v61 = vsel %vm2794_vm7, %v2517_v40, %v4474_v41 }
 0x48c   : > { %v4477_v3 = vpop.permute.xlu0 %4476  ;;  %v4411_v54 = vpack.c.bf16 %v2800_v61, %v2799_v32 }
 0x48d   : > { %v4479_v55 = vunpack.i.h.bf16 %v4477_v3  ;;  %v4478_v28 = vunpack.i.l.bf16 %v4477_v3 }
 0x48e   : > { %4412 = vmatprep.subr.bf16.mxu0 %v4411_v54 }
 0x48f   : > { %4414 = vmatpush3.bf16.msra.mxu0 %v4411_v54  ;;  %v2801_v52 = vsel %vm2794_vm7, %v2522_v16, %v4478_v28  ;;  %v2802_v31 = vsel %vm2794_vm7, %v2527_v59, %v4479_v55 }
 0x490   : > { %v4415_v35 = vpack.c.bf16 %v2802_v31, %v2801_v52 }
 0x492   : > { %4416 = vmatprep.subr.bf16.mxu0 %v4415_v35 }
 0x493   : > { %4418 = vmatpush3.bf16.msra.mxu0 %v4415_v35 }
 0x499   : > { %v2116_v8 = vpop.permute.xlu1 %2115 }
 0x49a   : > { %v2567_v2 = vadd.f32 %v5564_v60, %v2116_v8  ;;  %v3071_v8 = vld [vmem:[%s5748_s10] sm:$0xff] }
 0x49d   : > { %v2111_v12 = vpop.permute.xlu0 %2110  ;;  %v4482_v57 = vpop.permute.xlu1 %4481 }
 0x49e   : > { %v4484_v18 = vunpack.i.h.bf16 %v4482_v57  ;;  %v4483_v11 = vunpack.i.l.bf16 %v4482_v57  ;;  %v2562_v15 = vadd.f32 %v5566_v0, %v2111_v12  ;;  %v3073_v12 = vcombine.high %v3071_v8, %v3071_v8 }
 0x49f   : > { %v4532_v57 = vmov 0.0  }
 0x4a0   : > { %v2803_v63 = vsel %vm2794_vm7, %v2532_v45, %v4483_v11  ;;  %v2804_v36 = vsel %vm2794_vm7, %v2537_v9, %v4484_v18  ;;  %3364 = vmatprep.mubr.f32.mxu1 %v4532_v57 }
 0x4a1   : > { %v4487_v62 = vpop.permute.xlu0 %4486  ;;  %v4492_v58 = vpop.permute.xlu1 %4491  ;;  %v4419_v53 = vpack.c.bf16 %v2804_v36, %v2803_v63 }
 0x4a2   : > { %v4489_v47 = vunpack.i.h.bf16 %v4487_v62  ;;  %v4488_v7 = vunpack.i.l.bf16 %v4487_v62  ;;  %v4494_v10 = vunpack.i.h.bf16 %v4492_v58  ;;  %v4493_v14 = vunpack.i.l.bf16 %v4492_v58 }
 0x4a3   : > { %4420 = vmatprep.subr.bf16.mxu0 %v4419_v53 }
 0x4a4   : > { %4422 = vmatpush3.bf16.msra.mxu0 %v4419_v53  ;;  %v2805_v23 = vsel %vm2794_vm7, %v2542_v38, %v4488_v7  ;;  %v2806_v43 = vsel %vm2794_vm7, %v2547_v25, %v4489_v47  ;;  %v2807_v51 = vsel %vm2794_vm7, %v2552_v48, %v4493_v14  ;;  %v2808_v39 = vsel %vm2794_vm7, %v2557_v56, %v4494_v10 }
 0x4a5   : > { %v4497_v1 = vpop.permute.xlu0 %4496  ;;  %v4423_v13 = vpack.c.bf16 %v2806_v43, %v2805_v23  ;;  %v4427_v27 = vpack.c.bf16 %v2808_v39, %v2807_v51  ;;  %v3161_v39 = vld [vmem:[%s5749_s11] sm:$0xff] }
 0x4a6   : > { %v4499_v17 = vunpack.i.h.bf16 %v4497_v1  ;;  %v4498_v19 = vunpack.i.l.bf16 %v4497_v1  ;;  %v3163_v1 = vld [vmem:[%s5749_s11 + $0x10] sm:$0xff] }
 0x4a7   : > { %4424 = vmatprep.subr.bf16.mxu0 %v4423_v13 }
 0x4a8   : > { %4426 = vmatpush3.bf16.msra.mxu0 %v4423_v13  ;;  %v2809_v21 = vsel %vm2794_vm7, %v2562_v15, %v4498_v19  ;;  %v2810_v20 = vsel %vm2794_vm7, %v2567_v2, %v4499_v17  ;;  %v3162_v13 = vld [vmem:[%s5749_s11 + $0x8] sm:$0xff] }
 0x4a9   : > { %4428 = vmatprep.subr.bf16.mxu0 %v4427_v27  ;;  %v4431_v22 = vpack.c.bf16 %v2810_v20, %v2809_v21 }
 0x4ac   : > { %4430 = vmatpush3.bf16.msra.mxu0 %v4427_v27  ;;  %v3164_v27 = vld [vmem:[%s5749_s11 + $0x18] sm:$0xff] }
 0x4ad   : > { %4432 = vmatprep.subr.bf16.mxu0 %v4431_v22 }
 0x4b0   : > { %4434 = vmatpush3.bf16.msra.mxu0 %v4431_v22 }
 0x4b1   : > { %4293 = vmatprep.subr.msk.mxu0 %vm2794_vm7, %v5343_v49 }
 0x4cf   : > { %v2827_v24 = vpop.trf.xlu1 }
 0x4d0   : > { %4290 = vmatprep.mubr.f32.mxu0 %v2827_v24 }
 0x4d3   : > { %v2828_v60 = vpop.trf.xlu1 }
 0x4d4   : > { %4291 = vmatmul.mubr.f32.vlgmr.msra.gmra.mrb[96].mxu0 %v2828_v60  ;;  %v3169_v60 = vld [vmem:[%s5750_s12] sm:$0xf] }
 0x4d5   : > { %4294 = vmatpush3.xpose.msk.msra.mxu0 %vm2794_vm7, %v5343_v49 }
 0x4d6   : > { %3694 = vmatprep.subr.msk.mxu0 %vm1905_vm1, %v3073_v12 }
 0x5a7   : > { %v4292_v0 = vpop.f32.mrb[96].mxu0 }
 0x5a8   : > { %v2909_v30 = vpop.f32.mrb[97].mxu0  ;;  %v2934_v33 = vsel %vm2930_vm8, %v4292_v0, -inf  ;;  %v2921_v50 = vsel %vm2794_vm7, %v4292_v0, -inf }
 0x5a9   : > { %v2931_v29 = vsel %vm2930_vm8, %v2909_v30, -inf  ;;  %v2918_v34 = vsel %vm2794_vm7, %v2909_v30, -inf }
 0x5aa   : > { %2932 = vmax.xlane.f32.xlu0 %v2931_v29  ;;  %v3247_v29 = vld [vmem:[%s5751_s13 + $0x18] sm:$0xff] }
 0x5ae   : > { %2935 = vmax.xlane.f32.xlu0 %v2934_v33  ;;  %v3244_v33 = vld [vmem:[%s5751_s13] sm:$0xff] }
 0x5b2   : > { %2922 = vmax.xlane.f32.xlu0 %v2921_v50  ;;  %v3248_v50 = vld [vmem:[%s5751_s13 + $0x20] sm:$0xff] }
 0x5b6   : > { %2919 = vmax.xlane.f32.xlu0 %v2918_v34  ;;  %v3245_v34 = vld [vmem:[%s5751_s13 + $0x8] sm:$0xff] }
 0x637   : > { %v2933_v37 = vpop.xlane.xlu0 %2932 }
 0x638   : > { %v2937_v5 = vsub.f32 %v2909_v30, %v2933_v37  ;;  %v3249_v37 = vld [vmem:[%s5751_s13 + $0x28] sm:$0xff] }
 0x63a   : > { %v2939_v26 = vmul.f32 1.442695, %v2937_v5  ;;  %v3246_v5 = vld [vmem:[%s5751_s13 + $0x10] sm:$0xff] }
 0x63b   : > { %v2936_v40 = vpop.xlane.xlu0 %2935 }
 0x63c   : > { %4501 = vpow2.f32 %v2939_v26  ;;  %v2938_v44 = vsub.f32 %v4292_v0, %v2936_v40  ;;  %v3250_v26 = vld [vmem:[%s5751_s13 + $0x30] sm:$0xff]  ;;  %v3251_v40 = vld [vmem:[%s5751_s13 + $0x38] sm:$0xff] }
 0x63e   : > { %v2941_v49 = vmul.f32 1.442695, %v2938_v44 }
 0x63f   : > { %v2923_v46 = vpop.xlane.xlu0 %2922 }
 0x640   : > { %4503 = vpow2.f32 %v2941_v49  ;;  %v2925_v6 = vsub.f32 %v4292_v0, %v2923_v46 }
 0x642   : > { %v2928_v42 = vmul.f32 1.442695, %v2925_v6 }
 0x643   : > { %v2920_v4 = vpop.xlane.xlu0 %2919 }
 0x644   : > { %v2924_v41 = vsub.f32 %v2909_v30, %v2920_v4 }
 0x646   : > { %v4502_v32 = vpop.eup %4501  ;;  %v2926_v61 = vmul.f32 1.442695, %v2924_v41 }
 0x647   : > { %2953 = vrot.lane.b32.xlu0 %v4502_v32, %s4531_s25 }
 0x648   : > { %4505 = vpow2.f32 %v2926_v61 }
 0x649   : > { %4507 = vpow2.f32 %v2928_v42 }
 0x64a   : > { %v4504_v3 = vpop.eup %4503 }
 0x64b   : > { %2955 = vrot.lane.b32.xlu0 %v4504_v3, %s4531_s25 }
 0x652   : > { %v4506_v54 = vpop.eup %4505 }
 0x653   : > { %v4508_v59 = vpop.eup %4507  ;;  %4295 = vmatprep.mubr.msk.f32.mxu0 %vm2794_vm7, %v4506_v54  ;;  %v2943_v16 = vsel %vm2794_vm7, %v4506_v54, 0.0 }
 0x654   : > { %4296 = vmatmul.mubr.msk.f32.vlgmr.msra.gmra.mrb[98].mxu0 %vm2794_vm7, %v4508_v59  ;;  %v2946_v55 = vsel %vm2794_vm7, %v4508_v59, 0.0 }
 0x655   : > { %3695 = vmatpush1.msk.msra.mxu0 %vm1905_vm1, %v3071_v8 }
 0x66a   : > { %2944 = vadd.xlane.f32.xlu0 %v2943_v16 }
 0x66e   : > { %2947 = vadd.xlane.f32.xlu0 %v2946_v55 }
 0x6b9   : > { %v2954_v28 = vpop.permute.xlu0 %2953 }
 0x6ba   : > { %4298 = vmatprep.mubr.msk.f32.mxu0 %vm2794_vm7, %v2954_v28  ;;  %v2959_v52 = vsel %vm2794_vm7, %v2954_v28, 0.0 }
 0x6bb   : > { %2960 = vadd.xlane.f32.xlu1 %v2959_v52 }
 0x6bd   : > { %v2956_v31 = vpop.permute.xlu0 %2955 }
 0x6be   : > { %4299 = vmatmul.mubr.msk.f32.gmra.mrb[100].mxu0 %vm2794_vm7, %v2956_v31  ;;  %v2962_v35 = vsel %vm2794_vm7, %v2956_v31, 0.0 }
 0x6bf   : > { %2963 = vadd.xlane.f32.xlu0 %v2962_v35  ;;  %3148 = vmatprep.mubr.f32.mxu0 %v4532_v57 }
 0x6f7   : > { %v2945_v18 = vpop.xlane.xlu0 %2944 }
 0x6f8   : > { %4509 = vrcp.f32 %v2945_v18 }
 0x6fb   : > { %v2948_v11 = vpop.xlane.xlu0 %2947 }
 0x6fc   : > { %4511 = vrcp.f32 %v2948_v11 }
 0x702   : > { %v4510_v36 = vpop.eup %4509 }
 0x706   : > { %v4512_v38 = vpop.eup %4511 }
 0x727   : > { %v4297_v9 = vpop.f32.mrb[98].mxu0 }
 0x728   : > { %v3045_v45 = vpop.f32.mrb[99].mxu0  ;;  %v3065_v58 = vmul.f32 %v4512_v38, %v4297_v9 }
 0x729   : > { %v3064_v7 = vmul.f32 %v4510_v36, %v3045_v45 }
 0x748   : > { %v2961_v63 = vpop.xlane.xlu1 %2960 }
 0x74c   : > { %v2964_v25 = vpop.xlane.xlu0 %2963 }
 0x74d   : > { %4513 = vrcp.f32 %v2964_v25 }
 0x74e   : > { %4515 = vrcp.f32 %v2961_v63 }
 0x757   : > { %v4514_v56 = vpop.eup %4513 }
 0x758   : > { %v4516_v62 = vpop.eup %4515 }
 0x791   : > { %v4300_v48 = vpop.f32.mrb[100].mxu0 }
 0x792   : > { %v3067_v53 = vmul.f32 %v4514_v56, %v4300_v48  ;;  %v3055_v47 = vpop.f32.mrb[101].mxu0 }
 0x793   : > { %v3066_v10 = vmul.f32 %v4516_v62, %v3055_v47 }
 0x794   : > { %v3070_v14 = vsel %vm3068_vm9, %v3065_v58, %v3067_v53 }
 0x795   : > { %v3069_v23 = vsel %vm3068_vm9, %v3064_v7, %v3066_v10 }
 0x796   : > { %3696 = vmatmul.mubr.msk.f32.vlgmr.msra.gmra.mrb[102].mxu0 %vm1933_vm3, %v3069_v23 }
 0x797   : > { %3154 = vmatprep.mubr.f32.mxu0 %v4532_v57 }
 0x79a   : > { %3697 = vmatmul.mubr.msk.f32.gmra.mrb[104].mxu0 %vm1933_vm3, %v3070_v14 }
 0x79b   : > { %3237 = vmatprep.mubr.f32.mxu0 %v4532_v57 }
 0x869   : > { %v3150_v43 = vpop.f32.mrb[102].mxu0 }
 0x86a   : > { %v3152_v51 = vpop.f32.mrb[103].mxu0  ;;  %v3165_v15 = vmul.f32 %v3161_v39, %v3150_v43 }
 0x86b   : > { %v3166_v21 = vmul.f32 %v3162_v13, %v3152_v51 }
 0x86d   : > { %v3156_v2 = vpop.f32.mrb[104].mxu0 }
 0x86e   : > { %v3167_v17 = vmul.f32 %v3163_v1, %v3156_v2  ;;  %v3158_v19 = vpop.f32.mrb[105].mxu0 }
 0x86f   : > { %v3168_v20 = vmul.f32 %v3164_v27, %v3158_v19 }
 0x870   : > { %v4437_v22 = vpack.c.bf16 %v3167_v17, %v3165_v15 }
 0x871   : > { %v4435_v24 = vpack.c.bf16 %v3168_v20, %v3166_v21 }
 0x873   : > { %4436 = vmatprep.subr.bf16.mxu0 %v4435_v24 }
 0x874   : > { %4438 = vmatpush1.bf16.msra.mxu0 %v4437_v22 }
 0x877   : > { %3698 = vmatmul.mubr.msk.f32.vlgmr.msra.gmra.mrb[106].mxu0 %vm2794_vm7, %v3169_v60 }
 0x878   : > { %3346 = vmatprep.mubr.f32.mxu0 %v4532_v57 }
 0x94a   : > { %v3239_v0 = vpop.f32.mrb[106].mxu0 }
 0x94b   : > { %v3241_v30 = vpop.f32.mrb[107].mxu0 }
 0x94c   : > { %3699 = vmatprep.subr.msk.mxu0 %vm1905_vm1, %v3241_v30  ;;  %4439 = vmatprep.subr.msk.mxu1 %vm1905_vm1, %v3241_v30 }
 0x94d   : > { %3700 = vmatpush1.msk.msra.mxu0 %vm1905_vm1, %v3239_v0  ;;  %4440 = vmatpush1.msk.msra.mxu1 %vm1905_vm1, %v3239_v0 }
 0x94e   : > { %3704 = vmatmul.mubr.msk.f32.vlgmr.msra.gmra.mrb[84].mxu1 %vm1933_vm3, %v3247_v29  ;;  %3701 = vmatmul.mubr.msk.f32.vlgmr.msra.gmra.mrb[108].mxu0 %vm1933_vm3, %v3244_v33 }
 0x94f   : > { %3370 = vmatprep.mubr.f32.mxu1 %v4532_v57  ;;  %3352 = vmatprep.mubr.f32.mxu0 %v4532_v57 }
 0x952   : > { %3705 = vmatmul.mubr.msk.f32.gmra.mrb[86].mxu1 %vm1933_vm3, %v3248_v50  ;;  %3702 = vmatmul.mubr.msk.f32.gmra.mrb[110].mxu0 %vm1933_vm3, %v3245_v34 }
 0x953   : > { %3376 = vmatprep.mubr.f32.mxu1 %v4532_v57  ;;  %3358 = vmatprep.mubr.f32.mxu0 %v4532_v57 }
 0x956   : > { %3706 = vmatmul.mubr.msk.f32.gmra.mrb[88].mxu1 %vm1933_vm3, %v3249_v37  ;;  %3703 = vmatmul.mubr.msk.f32.gmra.mrb[112].mxu0 %vm1933_vm3, %v3246_v5 }
 0x957   : > { %3382 = vmatprep.mubr.f32.mxu1 %v4532_v57 }
 0x95a   : > { %3707 = vmatmul.mubr.msk.f32.gmra.mrb[90].mxu1 %vm1933_vm3, %v3250_v26 }
 0x95b   : > { %3388 = vmatprep.mubr.f32.mxu1 %v4532_v57 }
 0x95e   : > { %3708 = vmatmul.mubr.msk.f32.gmra.mrb[92].mxu1 %vm1933_vm3, %v3251_v40 }
 0xa21   : > { %v3366_v44 = vpop.f32.mrb[84].mxu1  ;;  %v3348_v49 = vpop.f32.mrb[108].mxu0 }
 0xa22   : > { %3401 = vst [vmem:[%s5717_s15 + $0x30] sm:$0xff] %v3366_v44  ;;  %v3368_v46 = vpop.f32.mrb[85].mxu1  ;;  %3395 = vst [vmem:[%s5717_s15] sm:$0xff] %v3348_v49  ;;  %v3350_v6 = vpop.f32.mrb[109].mxu0 }
 0xa23   : > { %3402 = vst [vmem:[%s5717_s15 + $0x38] sm:$0xff] %v3368_v46  ;;  %3396 = vst [vmem:[%s5717_s15 + $0x8] sm:$0xff] %v3350_v6 }
 0xa25   : > { %v3372_v4 = vpop.f32.mrb[86].mxu1  ;;  %v3354_v41 = vpop.f32.mrb[110].mxu0 }
 0xa26   : > { %3403 = vst [vmem:[%s5717_s15 + $0x40] sm:$0xff] %v3372_v4  ;;  %v3374_v42 = vpop.f32.mrb[87].mxu1  ;;  %3397 = vst [vmem:[%s5717_s15 + $0x10] sm:$0xff] %v3354_v41  ;;  %v3356_v32 = vpop.f32.mrb[111].mxu0 }
 0xa27   : > { %3404 = vst [vmem:[%s5717_s15 + $0x48] sm:$0xff] %v3374_v42  ;;  %3398 = vst [vmem:[%s5717_s15 + $0x18] sm:$0xff] %v3356_v32 }
 0xa29   : > { %v3378_v61 = vpop.f32.mrb[88].mxu1  ;;  %v3360_v3 = vpop.f32.mrb[112].mxu0 }
 0xa2a   : > { %3405 = vst [vmem:[%s5717_s15 + $0x50] sm:$0xff] %v3378_v61  ;;  %v3380_v54 = vpop.f32.mrb[89].mxu1  ;;  %3399 = vst [vmem:[%s5717_s15 + $0x20] sm:$0xff] %v3360_v3  ;;  %v3362_v59 = vpop.f32.mrb[113].mxu0 }
 0xa2b   : > { %3406 = vst [vmem:[%s5717_s15 + $0x58] sm:$0xff] %v3380_v54  ;;  %3400 = vst [vmem:[%s5717_s15 + $0x28] sm:$0xff] %v3362_v59 }
 0xa2d   : > { %v3384_v16 = vpop.f32.mrb[90].mxu1 }
 0xa2e   : > { %3407 = vst [vmem:[%s5717_s15 + $0x60] sm:$0xff] %v3384_v16  ;;  %v3386_v55 = vpop.f32.mrb[91].mxu1 }
 0xa2f   : > { %3408 = vst [vmem:[%s5717_s15 + $0x68] sm:$0xff] %v3386_v55 }
 0xa31   : > { %v3390_v28 = vpop.f32.mrb[92].mxu1 }
 0xa32   : > { %3409 = vst [vmem:[%s5717_s15 + $0x70] sm:$0xff] %v3390_v28  ;;  %v3392_v52 = vpop.f32.mrb[93].mxu1 }
 0xa33   : > { %3410 = vst [vmem:[%s5717_s15 + $0x78] sm:$0xff] %v3392_v52 }
 0xa34 PF: > { %s24_s29 = sadd.s32 1, %s4523_s29  }
 0xa35   : > { %p21_p4 = scmp.ge.s32.totalorder %s24_s29, 4  }
 0xa37   :  { %23 = sbr.rel (!%p21_p4) target bundleno = 1 (0x1), region = 121 }

</bundles_post_ra>
